<compile_context>
chip_gen: v5e
topology: v5e:2x2
jax: 0.10.0
libtpu: 0.0.40
codegen_flags: <defaults>
</compile_context>

<pallas_src>
import math

import jax
import jax.numpy as jnp
from jax.experimental import pallas as pl
from jax.experimental.pallas import tpu as pltpu

# Small, module-consistent shapes.
B, S, D, H, F = 2, 8, 32, 4, 64      # batch, seq, d_model, n_head, ffn_hidden
DH = D // H                          # per-head dim
N = B * S                            # flattened token count
EPS = 1e-12                          # DeePFAS LayerNorm eps
NEG = -1e9                           # mask fill value (matches reference)

assert F == 2 * D, "slab packing below assumes ffn_hidden == 2 * d_model"

# ---- packed weight-slab row offsets (all multiples of 8 -> tile-aligned) -------
R_QKV = 0            # [Wq*scale | Wk | Wv]^T                      (3D, D)
R_WO = 3 * D         # Wo^T                                        (D,  D)
R_W1 = 4 * D         # W1^T                                        (F,  D)
R_W2A = 4 * D + F    # W2^T[:, :F//2]                              (D,  D)
R_W2B = 5 * D + F    # W2^T[:, F//2:]                              (D,  D)
R_VEC = 6 * D + F    # bias / LayerNorm vectors, 4 used columns:   (3D, D)
                     #   col0: [bq*scale | bk | bv]
                     #   col1: [bo | b1]
                     #   col2: [g1 | be1 | b2]
                     #   col3: [g2 | be2 | 0]
R_TOTAL = R_VEC + 3 * D              # 352


def encoder_stack_kernel(xT_ref, mask_ref, wa_ref, out_ref, act_ref, bias_ref):
    """One grid step == one encoder layer. Feature-major layout: (features, tokens)."""
    layer = pl.program_id(0)

    @pl.when(layer == 0)
    def _init():
        act_ref[...] = xT_ref[...]
        # Additive attention bias: 0 where (same batch AND key kept), else -1e9.
        ri = jax.lax.broadcasted_iota(jnp.int32, (N, N), 0).astype(jnp.float32)
        ci = jax.lax.broadcasted_iota(jnp.int32, (N, N), 1).astype(jnp.float32)
        rb = ((ri + 0.5) * (1.0 / S)).astype(jnp.int32)   # query-token batch id
        cb = ((ci + 0.5) * (1.0 / S)).astype(jnp.int32)   # key-token batch id
        keep = mask_ref[...] > 0.0                        # (1, N) key-padding mask
        bias_ref[...] = jnp.where((rb == cb) & keep, 0.0, NEG)

    xT = act_ref[...]                                              # (D, N)

    # ---- fused Q|K|V projection (1/sqrt(DH) already folded into Wq/bq rows) ----
    qkvT = jnp.dot(wa_ref[R_QKV:R_QKV + 3 * D, :], xT,
                   preferred_element_type=jnp.float32)
    qkvT = qkvT + wa_ref[R_VEC:R_VEC + 3 * D, 0:1]                 # (3D, N)

    qh = qkvT[0 * D:1 * D].reshape(H, DH, N)                       # free sublane split
    kh = qkvT[1 * D:2 * D].reshape(H, DH, N)
    vh = qkvT[2 * D:3 * D].reshape(H, DH, N)

    # ---- multi-head attention, batched over heads -------------------------------
    s = jnp.einsum('htn,htm->hnm', qh, kh,
                   preferred_element_type=jnp.float32)             # (H, N, N)
    s = s + bias_ref[...]                                          # broadcast over H
    p = jnp.exp(s - jnp.max(s, axis=-1, keepdims=True))
    p = p * pl.reciprocal(jnp.sum(p, axis=-1, keepdims=True), approx=False)
    ctxT = jnp.einsum('htm,hnm->htn', vh, p,
                      preferred_element_type=jnp.float32).reshape(D, N)

    # ---- output projection -------------------------------------------------------
    attnT = jnp.dot(wa_ref[R_WO:R_WO + D, :], ctxT,
                    preferred_element_type=jnp.float32)
    attnT = attnT + wa_ref[R_VEC:R_VEC + D, 1:2]

    g1 = wa_ref[R_VEC:R_VEC + D, 2:3]
    be1 = wa_ref[R_VEC + D:R_VEC + 2 * D, 2:3]
    b2 = wa_ref[R_VEC + 2 * D:R_VEC + 3 * D, 2:3]
    g2 = wa_ref[R_VEC:R_VEC + D, 3:4]
    be2 = wa_ref[R_VEC + D:R_VEC + 2 * D, 3:4]

    # ---- dropout1 (identity) + residual + LayerNorm1 (feature axis = sublanes) --
    h1 = xT + attnT
    mu1 = jnp.mean(h1, axis=0, keepdims=True)
    var1 = jnp.mean((h1 - mu1) ** 2, axis=0, keepdims=True)
    h1n = (h1 - mu1) * jax.lax.rsqrt(var1 + EPS) * g1 + be1

    # ---- position-wise feed forward (internal dropout = identity) ---------------
    f = jnp.dot(wa_ref[R_W1:R_W1 + F, :], h1n,
                preferred_element_type=jnp.float32)
    f = jnp.maximum(f + wa_ref[R_VEC + D:R_VEC + D + F, 1:2], 0.0)  # ReLU
    f2 = (jnp.dot(wa_ref[R_W2A:R_W2A + D, :], f[:F // 2],
                  preferred_element_type=jnp.float32)
          + jnp.dot(wa_ref[R_W2B:R_W2B + D, :], f[F // 2:],
                    preferred_element_type=jnp.float32)
          + b2)

    # ---- dropout2 (identity) + residual + LayerNorm2 -----------------------------
    h2 = h1n + f2
    mu2 = jnp.mean(h2, axis=0, keepdims=True)
    var2 = jnp.mean((h2 - mu2) ** 2, axis=0, keepdims=True)
    outT = (h2 - mu2) * jax.lax.rsqrt(var2 + EPS) * g2 + be2

    act_ref[...] = outT          # carry to the next layer
    out_ref[...] = outT          # output block is resident; flushed once at grid end


# ---------------------------------------------------------------------------------
# One-time parameter packing (hoisted out of the per-call path).
# ---------------------------------------------------------------------------------
def pack_layer(params):
    (wq, bq, wk, bk, wv, bv, wo, bo, g1, be1, w1, b1, w2, b2, g2, be2) = params
    scale = 1.0 / math.sqrt(DH)

    col0 = jnp.concatenate([bq[0] * scale, bk[0], bv[0]])            # (3D,)
    col1 = jnp.concatenate([bo[0], b1[0]])                           # (D + F,) == (3D,)
    col2 = jnp.concatenate([g1[0], be1[0], b2[0]])                   # (3D,)
    col3 = jnp.concatenate([g2[0], be2[0], jnp.zeros((D,), jnp.float32)])
    vec = jnp.zeros((3 * D, D), jnp.float32)
    vec = vec.at[:, 0].set(col0).at[:, 1].set(col1).at[:, 2].set(col2).at[:, 3].set(col3)

    w2t = w2.T                                                       # (D, F)
    slab = jnp.concatenate([
        (wq * scale).T, wk.T, wv.T,                                  # (3D, D)
        wo.T,                                                        # (D,  D)
        w1.T,                                                        # (F,  D)
        w2t[:, :F // 2], w2t[:, F // 2:],                            # (2D, D)
        vec,                                                         # (3D, D)
    ], axis=0).astype(jnp.float32)
    assert slab.shape == (R_TOTAL, D)
    return slab


def pack_encoder_stack(layer_params_list):
    """Pack L layers' params into one (L, R_TOTAL, D) slab (do this ONCE)."""
    return jnp.stack([pack_layer(p) for p in layer_params_list], axis=0)


# ---------------------------------------------------------------------------------
# Per-call wrapper.
# ---------------------------------------------------------------------------------
def encoder_stack(x, mask, packed):
    """Apply L stacked EncoderLayers (eval mode) in ONE pallas_call.

    x: (B, S, D) f32; mask: (B, 1, S) with 1.0 = keep key, 0.0 = padded;
    packed: (L, R_TOTAL, D) from pack_encoder_stack().
    """
    num_layers = packed.shape[0]
    x_t = x.reshape(N, D).T                                          # (D, N) feature-major
    mask_v = mask.reshape(1, N).astype(jnp.float32)

    out_t = pl.pallas_call(
        encoder_stack_kernel,
        out_shape=jax.ShapeDtypeStruct((D, N), jnp.float32),
        grid_spec=pltpu.PrefetchScalarGridSpec(
            num_scalar_prefetch=0,
            grid=(num_layers,),                                      # one step per layer
            in_specs=[
                pl.BlockSpec((D, N), lambda l: (0, 0)),              # x: resident
                pl.BlockSpec((1, N), lambda l: (0, 0)),              # key-keep mask: resident
                pl.BlockSpec((None, R_TOTAL, D), lambda l: (l, 0, 0)),  # per-layer weights: pipelined
            ],
            out_specs=pl.BlockSpec((D, N), lambda l: (0, 0)),        # resident, flushed once
            scratch_shapes=[
                pltpu.VMEM((D, N), jnp.float32),                     # activation carried across layers
                pltpu.VMEM((N, N), jnp.float32),                     # additive attention-mask bias
            ],
        ),
        compiler_params=pltpu.CompilerParams(
            dimension_semantics=("arbitrary",),                      # layers are sequential; one TC
        ),
    )(x_t, mask_v, packed)

    return out_t.T.reshape(B, S, D)


# ---------------------------------------------------------------------------------
# Pure-JAX reference (sanity check).
# ---------------------------------------------------------------------------------
def reference_layer(x, mask, params):
    (wq, bq, wk, bk, wv, bv, wo, bo, g1, be1, w1, b1, w2, b2, g2, be2) = params

    def ln(h, g, be):
        mu = jnp.mean(h, axis=-1, keepdims=True)
        var = jnp.mean((h - mu) ** 2, axis=-1, keepdims=True)
        return (h - mu) / jnp.sqrt(var + EPS) * g[0] + be[0]

    q = x @ wq + bq[0]
    k = x @ wk + bk[0]
    v = x @ wv + bv[0]
    qh = q.reshape(B, S, H, DH).transpose(0, 2, 1, 3)
    kh = k.reshape(B, S, H, DH).transpose(0, 2, 1, 3)
    vh = v.reshape(B, S, H, DH).transpose(0, 2, 1, 3)
    s = jnp.einsum("bhqd,bhkd->bhqk", qh, kh) / math.sqrt(DH)
    keep = mask[:, None, :, :] > 0.0
    s = jnp.where(keep, s, NEG)
    p = jax.nn.softmax(s, axis=-1)
    ctx = jnp.einsum("bhqk,bhkd->bhqd", p, vh).transpose(0, 2, 1, 3).reshape(B, S, D)
    attn = ctx @ wo + bo[0]
    h1 = ln(x + attn, g1, be1)
    ff = jnp.maximum(h1 @ w1 + b1[0], 0.0) @ w2 + b2[0]
    return ln(h1 + ff, g2, be2)


def reference_stack(x, mask, layer_params_list):
    for p in layer_params_list:
        x = reference_layer(x, mask, p)
    return x


if __name__ == "__main__":
    key = jax.random.PRNGKey(0)

    def make_params(k):
        ks = jax.random.split(k, 16)
        w = lambda kk, shape: 0.1 * jax.random.normal(kk, shape, jnp.float32)
        return (
            w(ks[0], (D, D)), w(ks[1], (1, D)),                      # Wq, bq
            w(ks[2], (D, D)), w(ks[3], (1, D)),                      # Wk, bk
            w(ks[4], (D, D)), w(ks[5], (1, D)),                      # Wv, bv
            w(ks[6], (D, D)), w(ks[7], (1, D)),                      # Wo, bo
            1.0 + w(ks[8], (1, D)), w(ks[9], (1, D)),                # LN1 gamma, beta
            w(ks[10], (D, F)), w(ks[11], (1, F)),                    # FFN W1, b1
            w(ks[12], (F, D)), w(ks[13], (1, D)),                    # FFN W2, b2
            1.0 + w(ks[14], (1, D)), w(ks[15], (1, D)),              # LN2 gamma, beta
        )

    kx, kp = jax.random.split(key)
    x = jax.random.normal(kx, (B, S, D), jnp.float32)
    # key-padding mask: last 2 positions masked out, shape (B, 1, S)
    mask = jnp.broadcast_to((jnp.arange(S) < S - 2).astype(jnp.float32), (B, 1, S))

    # ---- L = 1: exactly the EncoderLayer module forward ------------------------
    params1 = make_params(kp)
    packed1 = pack_encoder_stack([params1])          # one-time packing (hoisted)
    out1 = jax.block_until_ready(encoder_stack(x, mask, packed1))
    ref1 = reference_layer(x, mask, params1)
    assert out1.shape == (B, S, D)
    err1 = float(jnp.max(jnp.abs(out1 - ref1)))
    assert jnp.allclose(out1, ref1, atol=2e-4, rtol=2e-4), \
        f"L=1 mismatch vs reference (max abs err {err1})"

    # ---- L = 3: stacked layers amortized in one pallas_call ---------------------
    params3 = [make_params(k) for k in jax.random.split(kp, 3)]
    packed3 = pack_encoder_stack(params3)
    out3 = jax.block_until_ready(encoder_stack(x, mask, packed3))
    ref3 = reference_stack(x, mask, params3)
    err3 = float(jnp.max(jnp.abs(out3 - ref3)))
    assert jnp.allclose(out3, ref3, atol=5e-4, rtol=5e-4), \
        f"L=3 mismatch vs reference (max abs err {err3})"

    print("KERNEL_OK")
</pallas_src>

<mosaic_0001>
module attributes {stable_mosaic.version = 11 : i64} {
  func.func @encoder_stack_kernel(%arg0: i32, %arg1: memref<32x16xf32, #tpu.memory_space<vmem>>, %arg2: memref<1x16xf32, #tpu.memory_space<vmem>>, %arg3: memref<1x352x32xf32, #tpu.memory_space<vmem>>, %arg4: memref<32x16xf32, #tpu.memory_space<vmem>>, %arg5: memref<32x16xf32, #tpu.memory_space<vmem>>, %arg6: memref<16x16xf32, #tpu.memory_space<vmem>>) attributes {dimension_semantics = [#tpu.dimension_semantics<arbitrary>], iteration_bounds = array<i64: 1>, scalar_prefetch = 0 : i64, scratch_operands = 2 : i64, tpu.core_type = #tpu.core_type<tc>, window_params = [{pipeline_mode = #tpu.pipeline_mode<synchronous>, transform_indices = @transform_0, window_bounds = array<i64: 32, 16>}, {pipeline_mode = #tpu.pipeline_mode<synchronous>, transform_indices = @transform_1, window_bounds = array<i64: 1, 16>}, {transform_indices = @transform_2, window_bounds = array<i64: 1, 352, 32>}, {pipeline_mode = #tpu.pipeline_mode<synchronous>, transform_indices = @transform_3, window_bounds = array<i64: 32, 16>}]} {
    %c0_i32 = arith.constant 0 : i32
    %0 = arith.cmpi eq, %arg0, %c0_i32 : i32
    %1 = arith.extui %0 : i1 to i32
    %c0_i32_0 = arith.constant 0 : i32
    %2 = arith.cmpi ne, %1, %c0_i32_0 : i32
    scf.if %2 {
      %c0_56 = arith.constant 0 : index
      %c0_57 = arith.constant 0 : index
      %119 = vector.load %arg1[%c0_56, %c0_57] : memref<32x16xf32, #tpu.memory_space<vmem>>, vector<32x16xf32>
      %c0_58 = arith.constant 0 : index
      %c0_59 = arith.constant 0 : index
      %120 = vector.load %arg5[%c0_58, %c0_59] : memref<32x16xf32, #tpu.memory_space<vmem>>, vector<32x16xf32>
      tpu.vector_store %arg5[%c0_58, %c0_59], %119 {strides = array<i32>} : memref<32x16xf32, #tpu.memory_space<vmem>>, vector<32x16xf32>,
      %121 = tpu.iota {dimensions = array<i32: 0>} : vector<16x16xi32>
      %122 = arith.sitofp %121 : vector<16x16xi32> to vector<16x16xf32>
      %123 = tpu.iota {dimensions = array<i32: 1>} : vector<16x16xi32>
      %124 = arith.sitofp %123 : vector<16x16xi32> to vector<16x16xf32>
      %cst_60 = arith.constant 5.000000e-01 : f32
      %125 = vector.broadcast %cst_60 : f32 to vector<16x16xf32>
      %126 = arith.addf %122, %125 : vector<16x16xf32>
      %cst_61 = arith.constant 1.250000e-01 : f32
      %127 = vector.broadcast %cst_61 : f32 to vector<16x16xf32>
      %128 = arith.mulf %126, %127 : vector<16x16xf32>
      %129 = arith.fptosi %128 : vector<16x16xf32> to vector<16x16xi32>
      %cst_62 = arith.constant 5.000000e-01 : f32
      %130 = vector.broadcast %cst_62 : f32 to vector<16x16xf32>
      %131 = arith.addf %124, %130 : vector<16x16xf32>
      %cst_63 = arith.constant 1.250000e-01 : f32
      %132 = vector.broadcast %cst_63 : f32 to vector<16x16xf32>
      %133 = arith.mulf %131, %132 : vector<16x16xf32>
      %134 = arith.fptosi %133 : vector<16x16xf32> to vector<16x16xi32>
      %c0_64 = arith.constant 0 : index
      %c0_65 = arith.constant 0 : index
      %135 = vector.load %arg2[%c0_64, %c0_65] : memref<1x16xf32, #tpu.memory_space<vmem>>, vector<1x16xf32>
      %cst_66 = arith.constant 0.000000e+00 : f32
      %136 = vector.broadcast %cst_66 : f32 to vector<1x16xf32>
      %137 = arith.cmpf ogt, %135, %136 : vector<1x16xf32>
      %138 = arith.cmpi eq, %129, %134 : vector<16x16xi32>
      %139 = vector.broadcast %137 : vector<1x16xi1> to vector<16x16xi1>
      %140 = arith.andi %138, %139 : vector<16x16xi1>
      %cst_67 = arith.constant 0.000000e+00 : f32
      %cst_68 = arith.constant -1.000000e+09 : f32
      %141 = vector.broadcast %cst_67 : f32 to vector<16x16xf32>
      %142 = vector.broadcast %cst_68 : f32 to vector<16x16xf32>
      %143 = arith.select %140, %141, %142 : vector<16x16xi1>, vector<16x16xf32>
      %c0_69 = arith.constant 0 : index
      %c0_70 = arith.constant 0 : index
      %144 = vector.load %arg6[%c0_69, %c0_70] : memref<16x16xf32, #tpu.memory_space<vmem>>, vector<16x16xf32>
      tpu.vector_store %arg6[%c0_69, %c0_70], %143 {strides = array<i32>} : memref<16x16xf32, #tpu.memory_space<vmem>>, vector<16x16xf32>,
    } else {
    }
    %c0 = arith.constant 0 : index
    %c0_1 = arith.constant 0 : index
    %3 = vector.load %arg5[%c0, %c0_1] : memref<32x16xf32, #tpu.memory_space<vmem>>, vector<32x16xf32>
    %c0_2 = arith.constant 0 : index
    %c0_3 = arith.constant 0 : index
    %c0_4 = arith.constant 0 : index
    %4 = vector.load %arg3[%c0_2, %c0_3, %c0_4] : memref<1x352x32xf32, #tpu.memory_space<vmem>>, vector<1x96x32xf32>
    %5 = vector.shape_cast %4 : vector<1x96x32xf32> to vector<96x32xf32>
    %cst = arith.constant dense<0.000000e+00> : vector<96x16xf32>
    %6 = tpu.matmul %5, %3, %cst {dimension_numbers = #tpu.dot_dimension_numbers<[1], [0], [0], [1], [0, 0, 1, 1], [], []>} : vector<96x32xf32>, vector<32x16xf32>, vector<96x16xf32> -> vector<96x16xf32>
    %c0_5 = arith.constant 0 : index
    %c256 = arith.constant 256 : index
    %c0_6 = arith.constant 0 : index
    %7 = vector.load %arg3[%c0_5, %c256, %c0_6] : memref<1x352x32xf32, #tpu.memory_space<vmem>>, vector<1x96x1xf32>
    %8 = vector.shape_cast %7 : vector<1x96x1xf32> to vector<96x1xf32>
    %9 = vector.broadcast %8 : vector<96x1xf32> to vector<96x16xf32>
    %10 = arith.addf %6, %9 : vector<96x16xf32>
    %11 = vector.extract_strided_slice %10 {offsets = [0, 0], sizes = [32, 16], strides = [1, 1]} : vector<96x16xf32> to vector<32x16xf32>
    %12 = vector.shape_cast %11 : vector<32x16xf32> to vector<4x8x16xf32>
    %13 = vector.extract_strided_slice %10 {offsets = [32, 0], sizes = [32, 16], strides = [1, 1]} : vector<96x16xf32> to vector<32x16xf32>
    %14 = vector.shape_cast %13 : vector<32x16xf32> to vector<4x8x16xf32>
    %15 = vector.extract_strided_slice %10 {offsets = [64, 0], sizes = [32, 16], strides = [1, 1]} : vector<96x16xf32> to vector<32x16xf32>
    %16 = vector.shape_cast %15 : vector<32x16xf32> to vector<4x8x16xf32>
    "tpu.trace_start"() <{level = 10 : i32, message = "htn,htm->hnm"}> : () -> ()
    %cst_7 = arith.constant dense<0.000000e+00> : vector<4x16x16xf32>
    %17 = tpu.matmul %12, %14, %cst_7 {dimension_numbers = #tpu.dot_dimension_numbers<[1], [1], [2], [2], [0, 0, 0, 2, 1, 2], [0], [0]>} : vector<4x8x16xf32>, vector<4x8x16xf32>, vector<4x16x16xf32> -> vector<4x16x16xf32>
    "tpu.trace_stop"() : () -> ()
    %c0_8 = arith.constant 0 : index
    %c0_9 = arith.constant 0 : index
    %18 = vector.load %arg6[%c0_8, %c0_9] : memref<16x16xf32, #tpu.memory_space<vmem>>, vector<16x16xf32>
    %19 = vector.shape_cast %18 : vector<16x16xf32> to vector<1x16x16xf32>
    %20 = vector.broadcast %19 : vector<1x16x16xf32> to vector<4x16x16xf32>
    %21 = arith.addf %17, %20 : vector<4x16x16xf32>
    %cst_10 = arith.constant dense<0xFF800000> : vector<4x16xf32>
    %22 = vector.multi_reduction <maximumf>, %21, %cst_10 [2] : vector<4x16x16xf32> to vector<4x16xf32>
    %23 = vector.shape_cast %22 : vector<4x16xf32> to vector<4x16x1xf32>
    %24 = vector.broadcast %23 : vector<4x16x1xf32> to vector<4x16x16xf32>
    %25 = arith.subf %21, %24 : vector<4x16x16xf32>
    %26 = math.exp %25 : vector<4x16x16xf32>
    %cst_11 = arith.constant dense<0.000000e+00> : vector<4x16xf32>
    %27 = vector.multi_reduction <add>, %26, %cst_11 [2] : vector<4x16x16xf32> to vector<4x16xf32>
    %28 = vector.shape_cast %27 : vector<4x16xf32> to vector<4x16x1xf32>
    %29 = tpu.reciprocal %28 : vector<4x16x1xf32> -> vector<4x16x1xf32>
    %30 = vector.broadcast %29 : vector<4x16x1xf32> to vector<4x16x16xf32>
    %31 = arith.mulf %26, %30 : vector<4x16x16xf32>
    "tpu.trace_start"() <{level = 10 : i32, message = "htm,hnm->htn"}> : () -> ()
    %cst_12 = arith.constant dense<0.000000e+00> : vector<4x8x16xf32>
    %32 = tpu.matmul %16, %31, %cst_12 {dimension_numbers = #tpu.dot_dimension_numbers<[2], [2], [1], [1], [0, 0, 0, 1, 1, 1], [0], [0]>} : vector<4x8x16xf32>, vector<4x16x16xf32>, vector<4x8x16xf32> -> vector<4x8x16xf32>
    "tpu.trace_stop"() : () -> ()
    %33 = vector.shape_cast %32 : vector<4x8x16xf32> to vector<32x16xf32>
    %c0_13 = arith.constant 0 : index
    %c96 = arith.constant 96 : index
    %c0_14 = arith.constant 0 : index
    %34 = vector.load %arg3[%c0_13, %c96, %c0_14] : memref<1x352x32xf32, #tpu.memory_space<vmem>>, vector<1x32x32xf32>
    %35 = vector.shape_cast %34 : vector<1x32x32xf32> to vector<32x32xf32>
    %cst_15 = arith.constant dense<0.000000e+00> : vector<32x16xf32>
    %36 = tpu.matmul %35, %33, %cst_15 {dimension_numbers = #tpu.dot_dimension_numbers<[1], [0], [0], [1], [0, 0, 1, 1], [], []>} : vector<32x32xf32>, vector<32x16xf32>, vector<32x16xf32> -> vector<32x16xf32>
    %c0_16 = arith.constant 0 : index
    %c256_17 = arith.constant 256 : index
    %c1 = arith.constant 1 : index
    %37 = vector.load %arg3[%c0_16, %c256_17, %c1] : memref<1x352x32xf32, #tpu.memory_space<vmem>>, vector<1x32x1xf32>
    %38 = vector.shape_cast %37 : vector<1x32x1xf32> to vector<32x1xf32>
    %39 = vector.broadcast %38 : vector<32x1xf32> to vector<32x16xf32>
    %40 = arith.addf %36, %39 : vector<32x16xf32>
    %c0_18 = arith.constant 0 : index
    %c256_19 = arith.constant 256 : index
    %c2 = arith.constant 2 : index
    %41 = vector.load %arg3[%c0_18, %c256_19, %c2] : memref<1x352x32xf32, #tpu.memory_space<vmem>>, vector<1x32x1xf32>
    %42 = vector.shape_cast %41 : vector<1x32x1xf32> to vector<32x1xf32>
    %c0_20 = arith.constant 0 : index
    %c288 = arith.constant 288 : index
    %c2_21 = arith.constant 2 : index
    %43 = vector.load %arg3[%c0_20, %c288, %c2_21] : memref<1x352x32xf32, #tpu.memory_space<vmem>>, vector<1x32x1xf32>
    %44 = vector.shape_cast %43 : vector<1x32x1xf32> to vector<32x1xf32>
    %c0_22 = arith.constant 0 : index
    %c320 = arith.constant 320 : index
    %c2_23 = arith.constant 2 : index
    %45 = vector.load %arg3[%c0_22, %c320, %c2_23] : memref<1x352x32xf32, #tpu.memory_space<vmem>>, vector<1x32x1xf32>
    %46 = vector.shape_cast %45 : vector<1x32x1xf32> to vector<32x1xf32>
    %c0_24 = arith.constant 0 : index
    %c256_25 = arith.constant 256 : index
    %c3 = arith.constant 3 : index
    %47 = vector.load %arg3[%c0_24, %c256_25, %c3] : memref<1x352x32xf32, #tpu.memory_space<vmem>>, vector<1x32x1xf32>
    %48 = vector.shape_cast %47 : vector<1x32x1xf32> to vector<32x1xf32>
    %c0_26 = arith.constant 0 : index
    %c288_27 = arith.constant 288 : index
    %c3_28 = arith.constant 3 : index
    %49 = vector.load %arg3[%c0_26, %c288_27, %c3_28] : memref<1x352x32xf32, #tpu.memory_space<vmem>>, vector<1x32x1xf32>
    %50 = vector.shape_cast %49 : vector<1x32x1xf32> to vector<32x1xf32>
    %51 = arith.addf %3, %40 : vector<32x16xf32>
    %cst_29 = arith.constant dense<0.000000e+00> : vector<16xf32>
    %52 = vector.multi_reduction <add>, %51, %cst_29 [0] : vector<32x16xf32> to vector<16xf32>
    %53 = vector.shape_cast %52 : vector<16xf32> to vector<1x16xf32>
    %cst_30 = arith.constant 3.200000e+01 : f32
    %54 = vector.broadcast %cst_30 : f32 to vector<1x16xf32>
    %55 = arith.divf %53, %54 : vector<1x16xf32>
    %56 = vector.broadcast %55 : vector<1x16xf32> to vector<32x16xf32>
    %57 = arith.subf %51, %56 : vector<32x16xf32>
    %58 = arith.mulf %57, %57 : vector<32x16xf32>
    %cst_31 = arith.constant dense<0.000000e+00> : vector<16xf32>
    %59 = vector.multi_reduction <add>, %58, %cst_31 [0] : vector<32x16xf32> to vector<16xf32>
    %60 = vector.shape_cast %59 : vector<16xf32> to vector<1x16xf32>
    %cst_32 = arith.constant 3.200000e+01 : f32
    %61 = vector.broadcast %cst_32 : f32 to vector<1x16xf32>
    %62 = arith.divf %60, %61 : vector<1x16xf32>
    %63 = vector.broadcast %55 : vector<1x16xf32> to vector<32x16xf32>
    %64 = arith.subf %51, %63 : vector<32x16xf32>
    %cst_33 = arith.constant 9.99999996E-13 : f32
    %65 = vector.broadcast %cst_33 : f32 to vector<1x16xf32>
    %66 = arith.addf %62, %65 : vector<1x16xf32>
    %67 = math.rsqrt %66 : vector<1x16xf32>
    %68 = vector.broadcast %67 : vector<1x16xf32> to vector<32x16xf32>
    %69 = arith.mulf %64, %68 : vector<32x16xf32>
    %70 = vector.broadcast %42 : vector<32x1xf32> to vector<32x16xf32>
    %71 = arith.mulf %69, %70 : vector<32x16xf32>
    %72 = vector.broadcast %44 : vector<32x1xf32> to vector<32x16xf32>
    %73 = arith.addf %71, %72 : vector<32x16xf32>
    %c0_34 = arith.constant 0 : index
    %c128 = arith.constant 128 : index
    %c0_35 = arith.constant 0 : index
    %74 = vector.load %arg3[%c0_34, %c128, %c0_35] : memref<1x352x32xf32, #tpu.memory_space<vmem>>, vector<1x64x32xf32>
    %75 = vector.shape_cast %74 : vector<1x64x32xf32> to vector<64x32xf32>
    %cst_36 = arith.constant dense<0.000000e+00> : vector<64x16xf32>
    %76 = tpu.matmul %75, %73, %cst_36 {dimension_numbers = #tpu.dot_dimension_numbers<[1], [0], [0], [1], [0, 0, 1, 1], [], []>} : vector<64x32xf32>, vector<32x16xf32>, vector<64x16xf32> -> vector<64x16xf32>
    %c0_37 = arith.constant 0 : index
    %c288_38 = arith.constant 288 : index
    %c1_39 = arith.constant 1 : index
    %77 = vector.load %arg3[%c0_37, %c288_38, %c1_39] : memref<1x352x32xf32, #tpu.memory_space<vmem>>, vector<1x64x1xf32>
    %78 = vector.shape_cast %77 : vector<1x64x1xf32> to vector<64x1xf32>
    %79 = vector.broadcast %78 : vector<64x1xf32> to vector<64x16xf32>
    %80 = arith.addf %76, %79 : vector<64x16xf32>
    %cst_40 = arith.constant 0.000000e+00 : f32
    %81 = vector.broadcast %cst_40 : f32 to vector<64x16xf32>
    %82 = arith.maximumf %80, %81 : vector<64x16xf32>
    %c0_41 = arith.constant 0 : index
    %c192 = arith.constant 192 : index
    %c0_42 = arith.constant 0 : index
    %83 = vector.load %arg3[%c0_41, %c192, %c0_42] : memref<1x352x32xf32, #tpu.memory_space<vmem>>, vector<1x32x32xf32>
    %84 = vector.shape_cast %83 : vector<1x32x32xf32> to vector<32x32xf32>
    %85 = vector.extract_strided_slice %82 {offsets = [0, 0], sizes = [32, 16], strides = [1, 1]} : vector<64x16xf32> to vector<32x16xf32>
    %cst_43 = arith.constant dense<0.000000e+00> : vector<32x16xf32>
    %86 = tpu.matmul %84, %85, %cst_43 {dimension_numbers = #tpu.dot_dimension_numbers<[1], [0], [0], [1], [0, 0, 1, 1], [], []>} : vector<32x32xf32>, vector<32x16xf32>, vector<32x16xf32> -> vector<32x16xf32>
    %c0_44 = arith.constant 0 : index
    %c224 = arith.constant 224 : index
    %c0_45 = arith.constant 0 : index
    %87 = vector.load %arg3[%c0_44, %c224, %c0_45] : memref<1x352x32xf32, #tpu.memory_space<vmem>>, vector<1x32x32xf32>
    %88 = vector.shape_cast %87 : vector<1x32x32xf32> to vector<32x32xf32>
    %89 = vector.extract_strided_slice %82 {offsets = [32, 0], sizes = [32, 16], strides = [1, 1]} : vector<64x16xf32> to vector<32x16xf32>
    %cst_46 = arith.constant dense<0.000000e+00> : vector<32x16xf32>
    %90 = tpu.matmul %88, %89, %cst_46 {dimension_numbers = #tpu.dot_dimension_numbers<[1], [0], [0], [1], [0, 0, 1, 1], [], []>} : vector<32x32xf32>, vector<32x16xf32>, vector<32x16xf32> -> vector<32x16xf32>
    %91 = arith.addf %86, %90 : vector<32x16xf32>
    %92 = vector.broadcast %46 : vector<32x1xf32> to vector<32x16xf32>
    %93 = arith.addf %91, %92 : vector<32x16xf32>
    %94 = arith.addf %73, %93 : vector<32x16xf32>
    %cst_47 = arith.constant dense<0.000000e+00> : vector<16xf32>
    %95 = vector.multi_reduction <add>, %94, %cst_47 [0] : vector<32x16xf32> to vector<16xf32>
    %96 = vector.shape_cast %95 : vector<16xf32> to vector<1x16xf32>
    %cst_48 = arith.constant 3.200000e+01 : f32
    %97 = vector.broadcast %cst_48 : f32 to vector<1x16xf32>
    %98 = arith.divf %96, %97 : vector<1x16xf32>
    %99 = vector.broadcast %98 : vector<1x16xf32> to vector<32x16xf32>
    %100 = arith.subf %94, %99 : vector<32x16xf32>
    %101 = arith.mulf %100, %100 : vector<32x16xf32>
    %cst_49 = arith.constant dense<0.000000e+00> : vector<16xf32>
    %102 = vector.multi_reduction <add>, %101, %cst_49 [0] : vector<32x16xf32> to vector<16xf32>
    %103 = vector.shape_cast %102 : vector<16xf32> to vector<1x16xf32>
    %cst_50 = arith.constant 3.200000e+01 : f32
    %104 = vector.broadcast %cst_50 : f32 to vector<1x16xf32>
    %105 = arith.divf %103, %104 : vector<1x16xf32>
    %106 = vector.broadcast %98 : vector<1x16xf32> to vector<32x16xf32>
    %107 = arith.subf %94, %106 : vector<32x16xf32>
    %cst_51 = arith.constant 9.99999996E-13 : f32
    %108 = vector.broadcast %cst_51 : f32 to vector<1x16xf32>
    %109 = arith.addf %105, %108 : vector<1x16xf32>
    %110 = math.rsqrt %109 : vector<1x16xf32>
    %111 = vector.broadcast %110 : vector<1x16xf32> to vector<32x16xf32>
    %112 = arith.mulf %107, %111 : vector<32x16xf32>
    %113 = vector.broadcast %48 : vector<32x1xf32> to vector<32x16xf32>
    %114 = arith.mulf %112, %113 : vector<32x16xf32>
    %115 = vector.broadcast %50 : vector<32x1xf32> to vector<32x16xf32>
    %116 = arith.addf %114, %115 : vector<32x16xf32>
    %c0_52 = arith.constant 0 : index
    %c0_53 = arith.constant 0 : index
    %117 = vector.load %arg5[%c0_52, %c0_53] : memref<32x16xf32, #tpu.memory_space<vmem>>, vector<32x16xf32>
    tpu.vector_store %arg5[%c0_52, %c0_53], %116 {strides = array<i32>} : memref<32x16xf32, #tpu.memory_space<vmem>>, vector<32x16xf32>,
    %c0_54 = arith.constant 0 : index
    %c0_55 = arith.constant 0 : index
    %118 = vector.load %arg4[%c0_54, %c0_55] : memref<32x16xf32, #tpu.memory_space<vmem>>, vector<32x16xf32>
    tpu.vector_store %arg4[%c0_54, %c0_55], %116 {strides = array<i32>} : memref<32x16xf32, #tpu.memory_space<vmem>>, vector<32x16xf32>,
    return
  }
  func.func @transform_0(%arg0: i32) -> (i32, i32) {
    %c0_i32 = arith.constant 0 : i32
    %c0_i32_0 = arith.constant 0 : i32
    %c0_i32_1 = arith.constant 0 : i32
    return %c0_i32, %c0_i32_0 : i32, i32
  }
  func.func @transform_1(%arg0: i32) -> (i32, i32) {
    %c0_i32 = arith.constant 0 : i32
    %c0_i32_0 = arith.constant 0 : i32
    %c0_i32_1 = arith.constant 0 : i32
    return %c0_i32, %c0_i32_0 : i32, i32
  }
  func.func @transform_2(%arg0: i32) -> (i32, i32, i32) {
    %c0_i32 = arith.constant 0 : i32
    %c0_i32_0 = arith.constant 0 : i32
    %c0_i32_1 = arith.constant 0 : i32
    return %arg0, %c0_i32, %c0_i32_0 : i32, i32, i32
  }
  func.func @transform_3(%arg0: i32) -> (i32, i32) {
    %c0_i32 = arith.constant 0 : i32
    %c0_i32_0 = arith.constant 0 : i32
    %c0_i32_1 = arith.constant 0 : i32
    return %c0_i32, %c0_i32_0 : i32, i32
  }
}

</mosaic_0001>

<bundles_post_ra>
// kernel: tpu_custom_call.1
= control target key start
LH: loop header
LB: loop body
LE: loop exit
PB: predicated region body
PF: predicated region fallthrough
CT: control target
= control target key end

     0   :  { %vm22_vm0 = vcmask 130048   ;;  %v27_v0 = vlaneseq  ;;  %v1460_v2 = vmov 0   ;;  %vm145_vm6 = vcmask 261120   ;;  %s2008_s0 = inlined_call_operand.vmem [shape: f32[32,16], index: 0, kind: input, shape index: {}]   ;;  %s2009_s1 = inlined_call_operand.vmem [shape: f32[1,16], index: 1, kind: input, shape index: {}]   ;;  %s2010_s2 = inlined_call_operand.vmem [shape: f32[1,352,32], index: 2, kind: input, shape index: {}]   ;;  %s2011_s3 = inlined_call_operand.vmem [shape: f32[32,16], index: 3, kind: output, shape index: {}]  }
   0x1   :  { %v21_v1 = vld [vmem:[%s2008_s0 + $0x18] sm:$0xff]  ;;  %1396 = vset.pattern.permute.xlu0 %v1460_v2  ;;  %v44_v3 = vld [vmem:[%s2009_s1] sm:$0x1]  ;;  %1397 = vset.pattern.permute.xlu1 %v1460_v2  ;;  %v20_v7 = vld [vmem:[%s2008_s0 + $0x10] sm:$0xff]  ;;  %v1461_v44 = vmov -1e+09  }
   0x2   :  { %v1495_v4 = vld [vmem:[%s2010_s2 + $0x100] sm:$0xff]  ;;  %26 = vst.msk [vmem:[#allocation2 + $0x18] sm:$0xff] %vm22_vm0, %v21_v1  ;;  %v28_v5 = vshrl.u32 %v27_v0, 7  ;;  %v33_v6 = vand.u32 127, %v27_v0  ;;  %v19_v8 = vld [vmem:[%s2008_s0 + $0x8] sm:$0xff]  ;;  %1398 = vset.pattern.permute.xlu2 %v1460_v2  ;;  %vm45_vm1 = vcmp.gt.f32.partialorder %v44_v3, 0.0 }
   0x3   :  { %87 = vperm.xlu0 %1396, %v1495_v4   ;;  %25 = vst.msk [vmem:[#allocation2 + $0x10] sm:$0xff] %vm22_vm0, %v20_v7  ;;  %v18_v9 = vld [vmem:[%s2008_s0] sm:$0xff]  ;;  %v48_v17 = vsel %vm45_vm1, 1, %v1460_v2  ;;  %v1520_v18 = vld [vmem:[%s2010_s2 + $0x108] sm:$0xff]  ;;  %v1533_v31 = vld [vmem:[%s2010_s2 + $0x110] sm:$0xff]  ;;  %vm269_vm11 = vcmask 64512  }
   0x4   :  { %v29_v10 = vadd.s32 8, %v28_v5  ;;  %v30_v11 = vcvt.s32.f32 %v28_v5  ;;  %v34_v12 = vcvt.s32.f32 %v33_v6  ;;  %24 = vst.msk [vmem:[#allocation2 + $0x8] sm:$0xff] %vm22_vm0, %v19_v8  ;;  %v1514_v13 = vld [vmem:[%s2010_s2 + $0x120] sm:$0xff]  ;;  %v49_v23 = vperm.slane %v48_v17, 0  ;;  %v1552_v43 = vld [vmem:[%s2010_s2 + $0x130] sm:$0xff]  ;;  %v1567_v47 = vld [vmem:[%s2010_s2 + $0x138] sm:$0xff] }
   0x5   :  { %23 = vst.msk [vmem:[#allocation2] sm:$0xff] %vm22_vm0, %v18_v9  ;;  %107 = vperm.xlu1 %1397, %v1514_v13   ;;  %v61_v41 = vld [vmem:[%s2010_s2] sm:$0xff]  ;;  %v62_v48 = vld [vmem:[%s2010_s2 + $0x8] sm:$0xff]  ;;  %v63_v49 = vld [vmem:[%s2010_s2 + $0x10] sm:$0xff] }
   0x6   :  { %v31_v14 = vcvt.s32.f32 %v29_v10  ;;  %v35_v15 = vadd.f32 0.5, %v30_v11  ;;  %v41_v16 = vadd.f32 0.5, %v34_v12  ;;  %vm1540_vm5 = vcmp.eq.s32.totalorder %v49_v23, 1  ;;  %v64_v50 = vld [vmem:[%s2010_s2 + $0x18] sm:$0xff]  ;;  %v65_v52 = vld [vmem:[%s2010_s2 + $0x20] sm:$0xff]  ;;  %v1595_v53 = vld [vmem:[%s2010_s2 + $0x128] sm:$0xff] }
   0x7   :  { %v1586_v51 = vld [vmem:[%s2010_s2 + $0x118] sm:$0xff]  ;;  %v66_v54 = vld [vmem:[%s2010_s2 + $0x28] sm:$0xff]  ;;  %v67_v55 = vld [vmem:[%s2010_s2 + $0x30] sm:$0xff] }
   0x8   :  { %v36_v19 = vadd.f32 0.5, %v31_v14  ;;  %v37_v20 = vmul.f32 0.125, %v35_v15  ;;  %v42_v21 = vmul.f32 0.125, %v41_v16  ;;  %102 = vperm.xlu2 %1398, %v1586_v51   ;;  %v68_v56 = vld [vmem:[%s2010_s2 + $0x38] sm:$0xff] }
   0x9   :  { %v1522_v22 = vld [vmem:[#allocation2 + $0x18] sm:$0xff] }
   0xa   :  { %194 = vmatpush.msra.mxu0 %v1522_v22  ;;  %v38_v24 = vmul.f32 0.125, %v36_v19  ;;  %vm1374_vm2 = vcmp.lt.s32.totalorder %v37_v20, 0  ;;  %v1375_v25 = vceil.f32 %v37_v20  ;;  %v1376_v26 = vfloor.f32 %v37_v20  ;;  %v1525_v27 = vld [vmem:[#allocation2 + $0x10] sm:$0xff]  ;;  %1368 = vmatpush.msra.mxu3 %v1522_v22  ;;  %v72_v0 = vld [vmem:[%s2010_s2 + $0x58] sm:$0xff] }
   0xb   :  { %92 = vperm.xlu0 %1396, %v1520_v18   ;;  %vm1384_vm3 = vcmp.lt.s32.totalorder %v42_v21, 0  ;;  %v1385_v28 = vceil.f32 %v42_v21  ;;  %v1386_v29 = vfloor.f32 %v42_v21  ;;  %v1528_v30 = vld [vmem:[#allocation2 + $0x8] sm:$0xff] }
   0xc   :  { %v1377_v32 = vsel %vm1374_vm2, %v1375_v25, %v1376_v26  ;;  %vm1379_vm4 = vcmp.lt.s32.totalorder %v38_v24, 0  ;;  %v1380_v33 = vceil.f32 %v38_v24  ;;  %v1381_v34 = vfloor.f32 %v38_v24  ;;  %195 = vmatpush.msra.mxu0 %v1525_v27  ;;  %v1537_v37 = vld [vmem:[#allocation2] sm:$0xff]  ;;  %1369 = vmatpush.msra.mxu3 %v1525_v27 }
   0xd   :  { %v1378_v35 = vcvt.f32.s32 %v1377_v32  ;;  %v1387_v36 = vsel %vm1384_vm3, %v1385_v28, %v1386_v29  ;;  %97 = vperm.xlu1 %1397, %v1533_v31  }
   0xe   :  { %v1382_v38 = vsel %vm1379_vm4, %v1380_v33, %v1381_v34  ;;  %v1388_v39 = vcvt.f32.s32 %v1387_v36  ;;  %196 = vmatpush.msra.mxu0 %v1528_v30  ;;  %1370 = vmatpush.msra.mxu3 %v1528_v30 }
   0xf   :  { %v1383_v42 = vcvt.f32.s32 %v1382_v38 }
  0x10   :  { %vm46_vm7 = vcmp.eq.s32.totalorder %v1378_v35, %v1388_v39  ;;  %197 = vmatpush.msra.mxu0 %v1537_v37  ;;  %1371 = vmatpush.msra.mxu3 %v1537_v37 }
  0x11   :  { %vm47_vm8 = vcmp.eq.s32.totalorder %v1383_v42, %v1388_v39  ;;  %vm51_vm9 = vmand %vm46_vm7, %vm1540_vm5  ;;  %1316 = vmatmul.msk.f32.vlgmr.msra.gmra.mxu0 %vm145_vm6, %v61_v41  ;;  %112 = vperm.xlu2 %1398, %v1595_v53  }
  0x12   :  { %vm52_vm10 = vmand %vm47_vm8, %vm1540_vm5  ;;  %v53_v45 = vsel %vm51_vm9, 0.0, %v1461_v44  ;;  %1327 = vmatmul.msk.f32.vlgmr.msra.gmra.mxu3 %vm145_vm6, %v72_v0 }
  0x13   :  { %117 = vperm.xlu0 %1396, %v1552_v43   ;;  %v54_v46 = vsel %vm52_vm10, 0.0, %v1461_v44  ;;  %55 = vst.msk [vmem:[#allocation3] sm:$0xff] %vm22_vm0, %v53_v45 }
  0x14   :  { %56 = vst.msk [vmem:[#allocation3 + $0x8] sm:$0xff] %vm22_vm0, %v54_v46 }
  0x15   :  { %122 = vperm.xlu1 %1397, %v1567_v47  }
  0x19   :  { %1317 = vmatmul.msk.f32.gmra.mxu0 %vm145_vm6, %v62_v48 }
  0x1a   :  { %v235_v41 = vld [vmem:[#allocation3] sm:$0xff] }
  0x1b   :  { %v236_v34 = vld [vmem:[#allocation3 + $0x8] sm:$0xff] }
  0x21   :  { %1318 = vmatmul.msk.f32.gmra.mxu0 %vm145_vm6, %v63_v49 }
  0x29   :  { %1319 = vmatmul.msk.f32.gmra.mxu0 %vm145_vm6, %v64_v50 }
  0x31   :  { %1320 = vmatmul.msk.f32.gmra.mxu0 %vm145_vm6, %v65_v52 }
  0x39   :  { %1321 = vmatmul.msk.f32.gmra.mxu0 %vm145_vm6, %v66_v54 }
  0x41   :  { %1322 = vmatmul.msk.f32.gmra.mxu0 %vm145_vm6, %v67_v55 }
  0x49   :  { %1323 = vmatmul.msk.f32.gmra.mxu0 %vm145_vm6, %v68_v56 }
  0x62   :  { %v103_v5 = vpop.permute.xlu2 %102 }
  0x6b   :  { %v113_v10 = vpop.permute.xlu2 %112 }
  0x75   :  { %v88_v57 = vpop.permute.xlu0 %87 }
  0x77   :  { %v108_v60 = vpop.permute.xlu1 %107 }
  0x7d   :  { %v93_v61 = vpop.permute.xlu0 %92 }
  0x7f   :  { %v98_v1 = vpop.permute.xlu1 %97 }
  0x85   :  { %v118_v20 = vpop.permute.xlu0 %117 }
  0x87   :  { %v123_v15 = vpop.permute.xlu1 %122 }
  0x8e   :  { %v199_v58 = vpop.f32.mrf.mxu0 }
  0x8f   :  { %v200_v59 = vadd.f32 %v199_v58, %v88_v57 }
  0x91   :  { %237 = vxpose.xlu2.b32.start.end [1/1] (short) (narrow) %v200_v59, 16 }
  0x95   :  { %v1623_v33 = vpop.f32.mrf.mxu3 }
  0x96   :  { %v202_v62 = vpop.f32.mrf.mxu0 }
  0x97   :  { %v203_v63 = vadd.f32 %v202_v62, %v93_v61 }
  0x99   :  { %299 = vxpose.xlu0.b32.start.end [1/1] (short) (narrow) %v203_v63, 16 }
  0x9e   :  { %v205_v2 = vpop.f32.mrf.mxu0 }
  0x9f   :  { %v206_v3 = vadd.f32 %v205_v2, %v98_v1 }
  0xa1   :  { %360 = vxpose.xlu1.b32.start.end [1/1] (short) (narrow) %v206_v3, 16 }
  0xa6   :  { %v208_v6 = vpop.f32.mrf.mxu0 }
  0xa7   :  { %v209_v7 = vadd.f32 %v208_v6, %v103_v5  ;;  %v69_v5 = vld [vmem:[%s2010_s2 + $0x40] sm:$0xff] }
  0xa8   :  { %1324 = vmatmul.msk.f32.gmra.mxu0 %vm145_vm6, %v69_v5 }
  0xa9   :  { %421 = vxpose.xlu2.b32.start.end [1/1] (short) (narrow) %v209_v7, 16 }
  0xae   :  { %v211_v8 = vpop.f32.mrf.mxu0 }
  0xaf   :  { %v212_v9 = vadd.f32 %v211_v8, %v108_v60 }
  0xb1   :  { %291 = vmatpush.msra.mxu1 %v212_v9  ;;  %1372 = vmatpush.msrb.mxu3 %v212_v9 }
  0xb6   :  { %v214_v11 = vpop.f32.mrf.mxu0 }
  0xb7   :  { %v215_v12 = vadd.f32 %v214_v11, %v113_v10  ;;  %v70_v10 = vld [vmem:[%s2010_s2 + $0x48] sm:$0xff] }
  0xb8   :  { %1325 = vmatmul.msk.f32.gmra.mxu0 %vm145_vm6, %v70_v10 }
  0xb9   :  { %352 = vmatpush.msra.mxu2 %v215_v12  ;;  %1373 = vmatpush.msra.mxu3 %v215_v12 }
  0xbe   :  { %v217_v14 = vpop.f32.mrf.mxu0 }
  0xbf   :  { %v218_v21 = vadd.f32 %v217_v14, %v118_v20 }
  0xc6   :  { %v220_v16 = vpop.f32.mrf.mxu0 }
  0xc7   :  { %v221_v17 = vadd.f32 %v220_v16, %v123_v15 }
  0xc9   :  { %474 = vmatpush.msrb.mxu1 %v221_v17 }
 0x12a   :  { %v253_v19 = vpop.trf.xlu2 }
 0x12b   :  { %1328 = vmatmul.msk.f32.vlgmr.msra.gmra.mxu1 %vm269_vm11, %v253_v19 }
 0x132   :  { %v254_v23 = vpop.trf.xlu2 }
 0x133   :  { %1329 = vmatmul.msk.f32.vlgmr.msrb.gmra.mxu3 %vm269_vm11, %v254_v23 }
 0x134   :  { %413 = vmatpush.msrb.mxu3 %v218_v21 }
 0x13d   :  { %v315_v24 = vpop.trf.xlu0 }
 0x13e   :  { %1330 = vmatmul.msk.f32.vlgmr.msra.gmra.mxu2 %vm269_vm11, %v315_v24 }
 0x142   :  { %v437_v25 = vpop.trf.xlu2 }
 0x143   :  { %1334 = vmatmul.msk.f32.vlgmr.msrb.gmra.mxu1 %vm269_vm11, %v437_v25 }
 0x145   :  { %v316_v26 = vpop.trf.xlu0  ;;  %v376_v28 = vpop.trf.xlu1 }
 0x146   :  { %1331 = vmatmul.msk.f32.vlgmr.msra.gmra.mxu3 %vm269_vm11, %v316_v26 }
 0x14a   :  { %v438_v29 = vpop.trf.xlu2 }
 0x14b   :  { %1335 = vmatmul.msk.f32.gmra.mxu1 %vm269_vm11, %v438_v29 }
 0x14d   :  { %v377_v32 = vpop.trf.xlu1 }
 0x14e   :  { %1332 = vmatmul.msk.f32.vlgmr.msrb.gmra.mxu3 %vm269_vm11, %v376_v28 }
 0x156   :  { %1333 = vmatmul.msk.f32.gmra.mxu3 %vm269_vm11, %v377_v32 }
 0x1a8   :  { %v293_v38 = vpop.f32.mrf.mxu1 }
 0x1a9   :  { %v294_v56 = vadd.f32 %v293_v38, %v235_v41 }
 0x1ab   :  { %v483_v60 = vsel %vm22_vm0, %v294_v56, -inf }
 0x1b6   :  { %v296_v35 = vpop.f32.mrf.mxu3 }
 0x1b7   :  { %v297_v36 = vadd.f32 %v296_v35, %v236_v34 }
 0x1b9   :  { %v486_v39 = vsel %vm22_vm0, %v297_v36, -inf }
 0x1ba   :  { %487 = vmax.xlane.f32.xlu2 %v486_v39 }
 0x1c0   :  { %v476_v40 = vpop.f32.mrf.mxu1 }
 0x1c1   :  { %v354_v42 = vpop.f32.mrf.mxu2  ;;  %v477_v55 = vadd.f32 %v476_v40, %v235_v41 }
 0x1c2   :  { %v355_v44 = vadd.f32 %v354_v42, %v235_v41  ;;  %v71_v42 = vld [vmem:[%s2010_s2 + $0x50] sm:$0xff] }
 0x1c3   :  { %v501_v59 = vsel %vm22_vm0, %v477_v55, -inf  ;;  %1326 = vmatmul.msk.f32.gmra.mxu0 %vm145_vm6, %v71_v42 }
 0x1c4   :  { %v489_v45 = vsel %vm22_vm0, %v355_v44, -inf }
 0x1c5   :  { %490 = vmax.xlane.f32.xlu1 %v489_v45 }
 0x1c8   :  { %v479_v46 = vpop.f32.mrf.mxu1 }
 0x1c9   :  { %v357_v48 = vpop.f32.mrf.mxu3  ;;  %v480_v49 = vadd.f32 %v479_v46, %v236_v34 }
 0x1ca   :  { %v358_v50 = vadd.f32 %v357_v48, %v236_v34 }
 0x1cb   :  { %v504_v52 = vsel %vm22_vm0, %v480_v49, -inf }
 0x1cc   :  { %v492_v54 = vsel %vm22_vm0, %v358_v50, -inf }
 0x1cd   :  { %493 = vmax.xlane.f32.xlu0 %v492_v54  ;;  %505 = vmax.xlane.f32.xlu1 %v504_v52 }
 0x1d1   :  { %v415_v57 = vpop.f32.mrf.mxu3 }
 0x1d2   :  { %v416_v58 = vadd.f32 %v415_v57, %v235_v41  ;;  %v1680_v57 = vld [vmem:[%s2010_s2 + $0x148] sm:$0xff] }
 0x1d4   :  { %v495_v61 = vsel %vm22_vm0, %v416_v58, -inf }
 0x1d5   :  { %484 = vmax.xlane.f32.xlu0 %v483_v60  ;;  %496 = vmax.xlane.f32.xlu2 %v495_v61  ;;  %v1698_v60 = vld [vmem:[%s2010_s2 + $0x150] sm:$0xff] }
 0x1d6   :  { %502 = vmax.xlane.f32.xlu1 %v501_v59  ;;  %v1691_v59 = vld [vmem:[%s2010_s2 + $0x140] sm:$0xff] }
 0x1d9   :  { %v418_v62 = vpop.f32.mrf.mxu3 }
 0x1da   :  { %v419_v63 = vadd.f32 %v418_v62, %v236_v34 }
 0x1dc   :  { %v498_v0 = vsel %vm22_vm0, %v419_v63, -inf }
 0x1dd   :  { %499 = vmax.xlane.f32.xlu0 %v498_v0 }
 0x22d   :  { %v488_v1 = vpop.xlane.xlu2 %487 }
 0x22e   :  { %v508_v2 = vsub.f32 %v297_v36, %v488_v1 }
 0x230   :  { %v517_v3 = vmul.f32 1.442695, %v508_v2 }
 0x232   :  { %1414 = vpow2.f32 %v517_v3 }
 0x238   :  { %v1637_v6 = vpop.eup %1414  ;;  %v491_v7 = vpop.xlane.xlu1 %490 }
 0x239   :  { %v509_v8 = vsub.f32 %v355_v44, %v491_v7  ;;  %v534_v9 = vsel %vm22_vm0, %v1637_v6, 0.0 }
 0x23a   :  { %535 = vadd.xlane.f32.xlu1 %v534_v9 }
 0x23b   :  { %v519_v11 = vmul.f32 1.442695, %v509_v8 }
 0x23d   :  { %1416 = vpow2.f32 %v519_v11 }
 0x240   :  { %v494_v12 = vpop.xlane.xlu0 %493  ;;  %v506_v16 = vpop.xlane.xlu1 %505 }
 0x241   :  { %v510_v23 = vsub.f32 %v358_v50, %v494_v12  ;;  %v514_v26 = vsub.f32 %v480_v49, %v506_v16 }
 0x243   :  { %v1645_v14 = vpop.eup %1416  ;;  %v521_v28 = vmul.f32 1.442695, %v510_v23  ;;  %v529_v29 = vmul.f32 1.442695, %v514_v26 }
 0x244   :  { %v537_v15 = vsel %vm22_vm0, %v1645_v14, 0.0 }
 0x245   :  { %538 = vadd.xlane.f32.xlu2 %v537_v15 }
 0x248   :  { %v485_v17 = vpop.xlane.xlu0 %484  ;;  %v497_v19 = vpop.xlane.xlu2 %496 }
 0x249   :  { %v507_v20 = vsub.f32 %v294_v56, %v485_v17  ;;  %v511_v21 = vsub.f32 %v416_v58, %v497_v19  ;;  %v503_v32 = vpop.xlane.xlu1 %502  ;;  %v1686_v58 = vld [vmem:[%s2010_s2 + $0x158] sm:$0xff] }
 0x24a   :  { %v513_v38 = vsub.f32 %v477_v55, %v503_v32 }
 0x24b   :  { %v515_v24 = vmul.f32 1.442695, %v507_v20  ;;  %v523_v25 = vmul.f32 1.442695, %v511_v21 }
 0x24c   :  { %v527_v45 = vmul.f32 1.442695, %v513_v38 }
 0x24d   :  { %1418 = vpow2.f32 %v515_v24 }
 0x24e   :  { %1420 = vpow2.f32 %v523_v25 }
 0x24f   :  { %1422 = vpow2.f32 %v521_v28 }
 0x250   :  { %v500_v34 = vpop.xlane.xlu0 %499  ;;  %1424 = vpow2.f32 %v529_v29 }
 0x251   :  { %v512_v35 = vsub.f32 %v419_v63, %v500_v34 }
 0x253   :  { %v1649_v36 = vpop.eup %1418  ;;  %v525_v39 = vmul.f32 1.442695, %v512_v35 }
 0x254   :  { %v531_v40 = vsel %vm22_vm0, %v1649_v36, 0.0  ;;  %v1653_v41 = vpop.eup %1420 }
 0x255   :  { %1426 = vpow2.f32 %v525_v39  ;;  %532 = vadd.xlane.f32.xlu0 %v531_v40  ;;  %v543_v44 = vsel %vm22_vm0, %v1653_v41, 0.0  ;;  %v1661_v46 = vpop.eup %1422 }
 0x256   :  { %544 = vadd.xlane.f32.xlu1 %v543_v44  ;;  %v1663_v48 = vpop.eup %1424  ;;  %1428 = vpow2.f32 %v527_v45  ;;  %v540_v50 = vsel %vm22_vm0, %v1661_v46, 0.0 }
 0x257   :  { %v552_v54 = vsel %vm22_vm0, %v1663_v48, 0.0 }
 0x25b   :  { %v1665_v49 = vpop.eup %1426 }
 0x25c   :  { %v546_v52 = vsel %vm22_vm0, %v1665_v49, 0.0  ;;  %v1673_v55 = vpop.eup %1428 }
 0x25d   :  { %541 = vadd.xlane.f32.xlu0 %v540_v50  ;;  %547 = vadd.xlane.f32.xlu2 %v546_v52  ;;  %v549_v56 = vsel %vm22_vm0, %v1673_v55, 0.0 }
 0x25e   :  { %553 = vadd.xlane.f32.xlu1 %v552_v54 }
 0x265   :  { %550 = vadd.xlane.f32.xlu0 %v549_v56 }
 0x275   :  { %132 = vperm.xlu2 %1398, %v1680_v57  }
 0x277   :  { %142 = vperm.xlu1 %1397, %v1686_v58  }
 0x279   :  { %127 = vperm.xlu0 %1396, %v1691_v59  }
 0x281   :  { %137 = vperm.xlu0 %1396, %v1698_v60  }
 0x2ad   :  { %v536_v61 = vpop.xlane.xlu1 %535 }
 0x2ae   :  { %1430 = vrcp.f32 %v536_v61  ;;  %v580_v1 = vand.u32 2147483648, %v536_v61  ;;  %v578_v5 = vand.u32 2147483647, %v536_v61  ;;  %vm574_vm13 = vweird.f32 %v536_v61 }
 0x2b0   :  { %v581_v8 = vor.u32 1.1754944e-38, %v580_v1  ;;  %vm579_vm15 = vcmp.eq.f32.partialorder %v578_v5, 8.507059e+37 }
 0x2b4   :  { %v1431_v62 = vpop.eup %1430 }
 0x2b5   :  { %v570_v63 = vmul.f32 %v1431_v62, %v536_v61  ;;  %vm575_vm12 = vweird.f32 %v1431_v62 }
 0x2b6   :  { %vm576_vm14 = vmor %vm574_vm13, %vm575_vm12 }
 0x2b7   :  { %v571_v0 = vsub.f32 1.0, %v570_v63 }
 0x2b8   :  { %v539_v2 = vpop.xlane.xlu2 %538 }
 0x2b9   :  { %v572_v3 = vmul.f32 %v1431_v62, %v571_v0  ;;  %1432 = vrcp.f32 %v539_v2  ;;  %v594_v24 = vand.u32 2147483648, %v539_v2  ;;  %vm588_vm2 = vweird.f32 %v539_v2 }
 0x2ba   :  { %v592_v29 = vand.u32 2147483647, %v539_v2 }
 0x2bb   :  { %v573_v7 = vadd.f32 %v1431_v62, %v572_v3  ;;  %v595_v44 = vor.u32 1.1754944e-38, %v594_v24 }
 0x2bc   :  { %vm593_vm5 = vcmp.eq.f32.partialorder %v592_v29, 8.507059e+37 }
 0x2bd   :  { %v577_v9 = vsel %vm576_vm14, %v1431_v62, %v573_v7 }
 0x2be   :  { %v582_v10 = vsel %vm579_vm15, %v581_v8, %v577_v9 }
 0x2bf   :  { %v668_v11 = vmul.f32 %v1637_v6, %v582_v10  ;;  %v1433_v12 = vpop.eup %1432 }
 0x2c0   :  { %v584_v15 = vmul.f32 %v1433_v12, %v539_v2  ;;  %vm589_vm1 = vweird.f32 %v1433_v12 }
 0x2c1   :  { %1336 = vmatpush.xpose.msk.msrb.mxu2 %vm22_vm0, %v668_v11  ;;  %vm1713_vm3 = vmor %vm588_vm2, %vm589_vm1 }
 0x2c2   :  { %v585_v16 = vsub.f32 1.0, %v584_v15 }
 0x2c4   :  { %v586_v20 = vmul.f32 %v1433_v12, %v585_v16 }
 0x2c6   :  { %v587_v23 = vadd.f32 %v1433_v12, %v586_v20 }
 0x2c8   :  { %v533_v17 = vpop.xlane.xlu0 %532  ;;  %v591_v42 = vsel %vm1713_vm3, %v1433_v12, %v587_v23 }
 0x2c9   :  { %1434 = vrcp.f32 %v533_v17  ;;  %v1703_v19 = vpop.xlane.xlu1 %544  ;;  %v566_v39 = vand.u32 2147483648, %v533_v17  ;;  %v564_v40 = vand.u32 2147483647, %v533_v17  ;;  %vm560_vm7 = vweird.f32 %v533_v17 }
 0x2ca   :  { %1436 = vrcp.f32 %v1703_v19  ;;  %v622_v50 = vand.u32 2147483648, %v1703_v19  ;;  %v1728_v62 = vsel %vm593_vm5, %v595_v44, %v591_v42  ;;  %vm616_vm8 = vweird.f32 %v1703_v19 }
 0x2cb   :  { %v567_v0 = vor.u32 1.1754944e-38, %v566_v39  ;;  %v620_v1 = vand.u32 2147483647, %v1703_v19  ;;  %vm1736_vm10 = vcmp.eq.f32.partialorder %v564_v40, 8.507059e+37 }
 0x2cc   :  { %v1740_v7 = vor.u32 1.1754944e-38, %v622_v50  ;;  %v791_v50 = vld [vmem:[%s2010_s2 + $0x60] sm:$0xff] }
 0x2cd   :  { %vm1757_vm14 = vcmp.eq.f32.partialorder %v620_v1, 8.507059e+37 }
 0x2cf   :  { %v1435_v21 = vpop.eup %1434 }
 0x2d0   :  { %v556_v25 = vmul.f32 %v1435_v21, %v533_v17  ;;  %v1706_v26 = vpop.xlane.xlu0 %541  ;;  %v1708_v6 = vpop.xlane.xlu2 %547  ;;  %vm561_vm4 = vweird.f32 %v1435_v21 }
 0x2d1   :  { %v1710_v28 = vpop.eup %1436  ;;  %1438 = vrcp.f32 %v1706_v26  ;;  %v1719_v38 = vpop.xlane.xlu1 %553  ;;  %v606_v54 = vand.u32 2147483647, %v1706_v26  ;;  %v608_v56 = vand.u32 2147483648, %v1706_v26  ;;  %vm1732_vm9 = vmor %vm560_vm7, %vm561_vm4  ;;  %vm602_vm11 = vweird.f32 %v1706_v26 }
 0x2d2   :  { %v557_v34 = vsub.f32 1.0, %v556_v25  ;;  %v612_v35 = vmul.f32 %v1710_v28, %v1703_v19  ;;  %1440 = vrcp.f32 %v1708_v6  ;;  %vm617_vm12 = vweird.f32 %v1710_v28 }
 0x2d3   :  { %1442 = vrcp.f32 %v1719_v38  ;;  %vm1752_vm13 = vcmp.eq.f32.partialorder %v606_v54, 8.507059e+37  ;;  %v609_v20 = vor.u32 1.1754944e-38, %v608_v56  ;;  %v636_v29 = vand.u32 2147483648, %v1708_v6  ;;  %vm1774_vm2 = vmor %vm616_vm8, %vm617_vm12 }
 0x2d4   :  { %v558_v45 = vmul.f32 %v1435_v21, %v557_v34  ;;  %v613_v52 = vsub.f32 1.0, %v612_v35  ;;  %v1765_v34 = vpop.f32.mrf.mxu0  ;;  %vm658_vm3 = vweird.f32 %v1719_v38  ;;  %v662_v56 = vand.u32 2147483647, %v1719_v38 }
 0x2d5   :  { %vm630_vm7 = vweird.f32 %v1708_v6  ;;  %v637_v2 = vor.u32 1.1754944e-38, %v636_v29 }
 0x2d6   :  { %v559_v61 = vadd.f32 %v1435_v21, %v558_v45  ;;  %v614_v12 = vmul.f32 %v1710_v28, %v613_v52  ;;  %v634_v45 = vand.u32 2147483647, %v1708_v6 }
 0x2d7   :  { %v1439_v63 = vpop.eup %1438 }
 0x2d8   :  { %v1441_v5 = vpop.eup %1440  ;;  %v598_v8 = vmul.f32 %v1439_v63, %v1706_v26  ;;  %v1744_v9 = vpop.xlane.xlu0 %550  ;;  %v563_v10 = vsel %vm1732_vm9, %v1435_v21, %v559_v61  ;;  %v664_v21 = vand.u32 2147483648, %v1719_v38  ;;  %vm603_vm15 = vweird.f32 %v1439_v63 }
 0x2d9   :  { %v1443_v11 = vpop.eup %1442  ;;  %v626_v15 = vmul.f32 %v1441_v5, %v1708_v6  ;;  %1444 = vrcp.f32 %v1744_v9  ;;  %v568_v32 = vsel %vm1736_vm10, %v567_v0, %v563_v10  ;;  %v615_v42 = vadd.f32 %v1710_v28, %v614_v12  ;;  %vm604_vm5 = vmor %vm602_vm11, %vm603_vm15 }
 0x2da   :  { %v599_v16 = vsub.f32 1.0, %v598_v8  ;;  %v654_v23 = vmul.f32 %v1443_v11, %v1719_v38  ;;  %v667_v40 = vmul.f32 %v1649_v36, %v568_v32  ;;  %vm631_vm1 = vweird.f32 %v1441_v5 }
 0x2db   :  { %v627_v25 = vsub.f32 1.0, %v626_v15  ;;  %vm659_vm4 = vweird.f32 %v1443_v11  ;;  %v665_v61 = vor.u32 1.1754944e-38, %v664_v21  ;;  %vm632_vm8 = vmor %vm630_vm7, %vm631_vm1  ;;  %vm635_vm10 = vcmp.eq.f32.partialorder %v634_v45, 8.507059e+37 }
 0x2dc   :  { %v600_v35 = vmul.f32 %v1439_v63, %v599_v16  ;;  %v655_v39 = vsub.f32 1.0, %v654_v23  ;;  %1337 = vmatpush.xpose.msk.msrb.mxu2 %vm22_vm0, %v667_v40  ;;  %vm660_vm9 = vmor %vm658_vm3, %vm659_vm4  ;;  %v619_v10 = vsel %vm1774_vm2, %v1710_v28, %v615_v42  ;;  %vm663_vm11 = vcmp.eq.f32.partialorder %v662_v56, 8.507059e+37 }
 0x2dd   :  { %v628_v44 = vmul.f32 %v1441_v5, %v627_v25  ;;  %v648_v16 = vand.u32 2147483647, %v1744_v9  ;;  %v650_v17 = vand.u32 2147483648, %v1744_v9  ;;  %v624_v28 = vsel %vm1757_vm14, %v1740_v7, %v619_v10 }
 0x2de   :  { %v601_v52 = vadd.f32 %v1439_v63, %v600_v35  ;;  %v656_v54 = vmul.f32 %v1443_v11, %v655_v39  ;;  %v669_v21 = vmul.f32 %v1645_v14, %v1728_v62  ;;  %v671_v25 = vmul.f32 %v1653_v41, %v624_v28 }
 0x2df   :  { %v1445_v36 = vpop.eup %1444  ;;  %v629_v0 = vadd.f32 %v1441_v5, %v628_v44  ;;  %vm649_vm1 = vcmp.eq.f32.partialorder %v648_v16, 8.507059e+37  ;;  %v1462_v42 = vmov 1   ;;  %v1463_v45 = vmov 2  }
 0x2e0   :  { %v605_v19 = vsel %vm604_vm5, %v1439_v63, %v601_v52  ;;  %v657_v1 = vadd.f32 %v1443_v11, %v656_v54  ;;  %v640_v3 = vmul.f32 %v1445_v36, %v1744_v9  ;;  %vm645_vm12 = vweird.f32 %v1445_v36  ;;  %1400 = vset.pattern.permute.xlu1 %v1462_v42  ;;  %1401 = vset.pattern.permute.xlu0 %v1462_v42  ;;  %v792_v52 = vld [vmem:[%s2010_s2 + $0x68] sm:$0xff] }
 0x2e1   :  { %v610_v8 = vsel %vm1752_vm13, %v609_v20, %v605_v19  ;;  %v633_v26 = vsel %vm632_vm8, %v1441_v5, %v629_v0  ;;  %v226_v5 = vpop.f32.mrf.mxu0  ;;  %vm644_vm13 = vweird.f32 %v1744_v9  ;;  %806 = vperm.xlu1 %1400, %v1520_v18   ;;  %811 = vperm.xlu0 %1401, %v1533_v31  }
 0x2e2   :  { %v661_v6 = vsel %vm660_vm9, %v1443_v11, %v657_v1  ;;  %v638_v63 = vsel %vm635_vm10, %v637_v2, %v633_v26  ;;  %v641_v12 = vsub.f32 1.0, %v640_v3  ;;  %v670_v15 = vmul.f32 %v1661_v46, %v610_v8  ;;  %v133_v11 = vpop.permute.xlu2 %132  ;;  %vm646_vm15 = vmor %vm644_vm13, %vm645_vm12  ;;  %1399 = vset.pattern.permute.xlu2 %v1462_v42 }
 0x2e3   :  { %v672_v20 = vmul.f32 %v1665_v49, %v638_v63  ;;  %v666_v38 = vsel %vm663_vm11, %v665_v61, %v661_v6  ;;  %v651_v49 = vor.u32 1.1754944e-38, %v650_v17  ;;  %v227_v24 = vadd.f32 %v226_v5, %v133_v11  ;;  %801 = vperm.xlu2 %1399, %v1495_v4  }
 0x2e4   :  { %v642_v23 = vmul.f32 %v1445_v36, %v641_v12  ;;  %1339 = vmatpush.xpose.msk.msra.mxu3 %vm22_vm0, %v670_v15  ;;  %v674_v29 = vmul.f32 %v1663_v48, %v666_v38 }
 0x2e5   :  { %1342 = vmatpush.xpose.msk.msra.mxu2 %vm22_vm0, %v672_v20 }
 0x2e6   :  { %v643_v46 = vadd.f32 %v1445_v36, %v642_v23 }
 0x2e8   :  { %1340 = vmatpush.xpose.msk.msra.mxu3 %vm22_vm0, %v669_v21  ;;  %v647_v7 = vsel %vm646_vm15, %v1445_v36, %v643_v46 }
 0x2e9   :  { %1343 = vmatpush.xpose.msk.msra.mxu2 %vm22_vm0, %v671_v25  ;;  %v652_v9 = vsel %vm649_vm1, %v651_v49, %v647_v7  ;;  %v143_v41 = vpop.permute.xlu1 %142  ;;  %v229_v62 = vpop.f32.mrf.mxu0  ;;  %1402 = vset.pattern.permute.xlu1 %v1463_v45 }
 0x2ea   :  { %v673_v32 = vmul.f32 %v1673_v55, %v652_v9  ;;  %v233_v48 = vadd.f32 %v1623_v33, %v143_v41  ;;  %1404 = vset.pattern.permute.xlu0 %v1463_v45  ;;  %943 = vperm.xlu1 %1402, %v1586_v51  }
 0x2eb   :  { %v128_v35 = vpop.permute.xlu0 %127  ;;  %1341 = vmatmul.msk.f32.vlgmr.msra.gmra.mxu3 %vm22_vm0, %v227_v24  ;;  %816 = vperm.xlu2 %1399, %v1586_v51  }
 0x2ec   :  { %1345 = vmatpush.xpose.msk.msrb.mxu3 %vm22_vm0, %v674_v29  ;;  %v224_v14 = vadd.f32 %v1765_v34, %v128_v35  ;;  %935 = vperm.xlu0 %1404, %v1520_v18   ;;  %v793_v18 = vld [vmem:[%s2010_s2 + $0x70] sm:$0xff] }
 0x2ee   :  { %1338 = vmatmul.msk.f32.vlgmr.msrb.gmra.mxu2 %vm22_vm0, %v224_v14 }
 0x2f0   :  { %1346 = vmatpush.xpose.msk.msrb.mxu3 %vm22_vm0, %v673_v32 }
 0x2f2   :  { %967 = vperm.xlu1 %1402, %v1567_v47  }
 0x2f3   :  { %v138_v39 = vpop.permute.xlu0 %137  ;;  %1347 = vmatmul.msk.f32.vlgmr.msrb.gmra.mxu3 %vm22_vm0, %v233_v48  ;;  %1403 = vset.pattern.permute.xlu2 %v1463_v45 }
 0x2f4   :  { %v230_v40 = vadd.f32 %v229_v62, %v138_v39  ;;  %1405 = vset.pattern.permute.xlu0 %v1462_v42  ;;  %939 = vperm.xlu2 %1403, %v1533_v31   ;;  %v794_v31 = vld [vmem:[%s2010_s2 + $0x78] sm:$0xff] }
 0x2f5   :  { %1023 = vperm.xlu0 %1405, %v1686_v58  }
 0x2f6   :  { %1344 = vmatmul.msk.f32.vlgmr.msra.gmra.mxu2 %vm22_vm0, %v230_v40 }
 0x2fa   :  { %931 = vperm.xlu1 %1402, %v1495_v4  }
 0x2fc   :  { %962 = vperm.xlu2 %1403, %v1552_v43  }
 0x2fd   :  { %998 = vperm.xlu0 %1405, %v1552_v43  }
 0x302   :  { %952 = vperm.xlu1 %1402, %v1514_v13  }
 0x304   :  { %957 = vperm.xlu2 %1403, %v1595_v53  }
 0x305   :  { %1408 = vset.pattern.permute.xlu0 %v1463_v45 }
 0x306   :  { %1190 = vperm.xlu0 %1408, %v1691_v59  }
 0x30a   :  { %1407 = vset.pattern.permute.xlu1 %v1462_v42 }
 0x30b   :  { %1013 = vperm.xlu1 %1407, %v1680_v57  }
 0x30c   :  { %1406 = vset.pattern.permute.xlu2 %v1462_v42 }
 0x30d   :  { %1018 = vperm.xlu2 %1406, %v1698_v60  }
 0x313   :  { %1008 = vperm.xlu1 %1407, %v1691_v59  }
 0x315   :  { %1003 = vperm.xlu2 %1406, %v1567_v47   ;;  %v1464_v47 = vmov 32.0  }
 0x316   :  { %1446 = vrcp.f32 %v1464_v47 }
 0x31b   :  { %988 = vperm.xlu1 %1407, %v1514_v13  }
 0x31d   :  { %993 = vperm.xlu2 %1406, %v1595_v53  }
 0x323   :  { %1410 = vset.pattern.permute.xlu1 %v1463_v45 }
 0x324   :  { %1198 = vperm.xlu1 %1410, %v1698_v60  }
 0x325   :  { %1409 = vset.pattern.permute.xlu2 %v1463_v45 }
 0x326   :  { %1194 = vperm.xlu2 %1409, %v1680_v57   ;;  %v1447_v57 = vpop.eup %1446 }
 0x327   :  { %v886_v26 = vmul.f32 32.0, %v1447_v57  ;;  %vm890_vm14 = vweird.f32 %v1447_v57 }
 0x32e   :  { %1202 = vperm.xlu2 %1409, %v1686_v58  }
 0x33d   :  { %v802_v54 = vpop.permute.xlu2 %801 }
 0x345   :  { %v817_v19 = vpop.permute.xlu2 %816 }
 0x353   :  { %v807_v51 = vpop.permute.xlu1 %806  ;;  %v812_v36 = vpop.permute.xlu0 %811 }
 0x35c   :  { %v944_v45 = vpop.permute.xlu1 %943 }
 0x36e   :  { %v730_v55 = vpop.f32.mrf.mxu3 }
 0x371   :  { %v701_v44 = vpop.f32.mrf.mxu2 }
 0x376   :  { %v788_v33 = vpop.f32.mrf.mxu3 }
 0x377   :  { %843 = vmatpush.msra.mxu1 %v788_v33 }
 0x379   :  { %v759_v34 = vpop.f32.mrf.mxu2 }
 0x37a   :  { %844 = vmatpush.msra.mxu1 %v759_v34 }
 0x37c   :  { %845 = vmatpush.msra.mxu1 %v730_v55 }
 0x37e   :  { %846 = vmatpush.msra.mxu1 %v701_v44 }
 0x37f   :  { %1348 = vmatmul.msk.f32.vlgmr.msra.gmra.mxu1 %vm145_vm6, %v791_v50 }
 0x387   :  { %1349 = vmatmul.msk.f32.gmra.mxu1 %vm145_vm6, %v792_v52  ;;  %v940_v52 = vpop.permute.xlu2 %939 }
 0x38f   :  { %1350 = vmatmul.msk.f32.gmra.mxu1 %vm145_vm6, %v793_v18 }
 0x397   :  { %1351 = vmatmul.msk.f32.gmra.mxu1 %vm145_vm6, %v794_v31 }
 0x3fc   :  { %v848_v4 = vpop.f32.mrf.mxu1 }
 0x3fd   :  { %v849_v13 = vadd.f32 %v848_v4, %v802_v54  ;;  %v968_v4 = vpop.permute.xlu1 %967 }
 0x3ff   :  { %v868_v60 = vadd.f32 %v849_v13, %v1537_v37  ;;  %v887_v37 = vsub.f32 1.0, %v886_v26 }
 0x401   :  { %v872_v2 = vsel %vm22_vm0, %v868_v60, 0.0  ;;  %v888_v15 = vmul.f32 %v1447_v57, %v887_v37  ;;  %v976_v37 = vld [vmem:[%s2010_s2 + $0x90] sm:$0xff] }
 0x403   :  { %v889_v20 = vadd.f32 %v1447_v57, %v888_v15  ;;  %v979_v15 = vld [vmem:[%s2010_s2 + $0xa8] sm:$0xff] }
 0x404   :  { %v851_v43 = vpop.f32.mrf.mxu1 }
 0x405   :  { %v852_v59 = vadd.f32 %v851_v43, %v807_v51  ;;  %v1866_v28 = vsel %vm890_vm14, %v1447_v57, %v889_v20  ;;  %v932_v47 = vpop.permute.xlu1 %931 }
 0x407   :  { %v869_v53 = vadd.f32 %v852_v59, %v1528_v30  ;;  %v963_v59 = vpop.permute.xlu2 %962 }
 0x409   :  { %v873_v58 = vsel %vm22_vm0, %v869_v53, 0.0 }
 0x40a   :  { %v874_v10 = vadd.f32 %v873_v58, %v872_v2 }
 0x40c   :  { %v854_v56 = vpop.f32.mrf.mxu1 }
 0x40d   :  { %v855_v61 = vadd.f32 %v854_v56, %v812_v36 }
 0x40f   :  { %v870_v0 = vadd.f32 %v855_v61, %v1525_v27 }
 0x411   :  { %v875_v3 = vsel %vm22_vm0, %v870_v0, 0.0 }
 0x412   :  { %v876_v63 = vadd.f32 %v875_v3, %v874_v10  ;;  %v953_v10 = vpop.permute.xlu1 %952 }
 0x414   :  { %v857_v1 = vpop.f32.mrf.mxu1 }
 0x415   :  { %v858_v8 = vadd.f32 %v857_v1, %v817_v19 }
 0x417   :  { %v871_v6 = vadd.f32 %v858_v8, %v1522_v22  ;;  %v958_v8 = vpop.permute.xlu2 %957 }
 0x419   :  { %v877_v30 = vsel %vm22_vm0, %v871_v6, 0.0 }
 0x41a   :  { %v878_v12 = vadd.f32 %v877_v30, %v876_v63  ;;  %v974_v63 = vld [vmem:[%s2010_s2 + $0x80] sm:$0xff]  ;;  %v975_v30 = vld [vmem:[%s2010_s2 + $0x88] sm:$0xff] }
 0x41c   :  { %v879_v27 = vrot.slane %v878_v12, 4 }
 0x41e   :  { %v880_v16 = vadd.f32 %v879_v27, %v878_v12  ;;  %v977_v12 = vld [vmem:[%s2010_s2 + $0x98] sm:$0xff]  ;;  %v978_v27 = vld [vmem:[%s2010_s2 + $0xa0] sm:$0xff] }
 0x420   :  { %v881_v17 = vrot.slane %v880_v16, 2 }
 0x422   :  { %v882_v38 = vadd.f32 %v881_v17, %v880_v16  ;;  %v980_v16 = vld [vmem:[%s2010_s2 + $0xb0] sm:$0xff]  ;;  %v981_v17 = vld [vmem:[%s2010_s2 + $0xb8] sm:$0xff] }
 0x424   :  { %v883_v23 = vrot.slane %v882_v38, 1 }
 0x426   :  { %v884_v5 = vadd.f32 %v883_v23, %v882_v38  ;;  %v1019_v38 = vpop.permute.xlu2 %1018  ;;  %v1014_v23 = vpop.permute.xlu1 %1013 }
 0x428   :  { %v892_v46 = vmul.f32 %v1866_v28, %v884_v5 }
 0x42a   :  { %v893_v11 = vsub.f32 %v868_v60, %v892_v46  ;;  %v894_v22 = vsub.f32 %v869_v53, %v892_v46  ;;  %v895_v21 = vsub.f32 %v870_v0, %v892_v46  ;;  %v896_v49 = vsub.f32 %v871_v6, %v892_v46  ;;  %v936_v60 = vpop.permute.xlu0 %935 }
 0x42c   :  { %v897_v25 = vmul.f32 %v893_v11, %v893_v11  ;;  %v898_v29 = vmul.f32 %v894_v22, %v894_v22  ;;  %v899_v7 = vmul.f32 %v895_v21, %v895_v21  ;;  %v900_v24 = vmul.f32 %v896_v49, %v896_v49 }
 0x42e   :  { %v901_v9 = vsel %vm22_vm0, %v897_v25, 0.0  ;;  %v902_v32 = vsel %vm22_vm0, %v898_v29, 0.0  ;;  %v904_v14 = vsel %vm22_vm0, %v899_v7, 0.0  ;;  %v906_v48 = vsel %vm22_vm0, %v900_v24, 0.0 }
 0x42f   :  { %v903_v35 = vadd.f32 %v902_v32, %v901_v9 }
 0x431   :  { %v905_v41 = vadd.f32 %v904_v14, %v903_v35 }
 0x432   :  { %v1024_v46 = vpop.permute.xlu0 %1023 }
 0x433   :  { %v907_v62 = vadd.f32 %v906_v48, %v905_v41 }
 0x435   :  { %v908_v39 = vrot.slane %v907_v62, 4 }
 0x437   :  { %v909_v40 = vadd.f32 %v908_v39, %v907_v62 }
 0x439   :  { %v910_v55 = vrot.slane %v909_v40, 2 }
 0x43b   :  { %v911_v42 = vadd.f32 %v910_v55, %v909_v40  ;;  %v1099_v40 = vld [vmem:[%s2010_s2 + $0xc0] sm:$0xff] }
 0x43d   :  { %v912_v44 = vrot.slane %v911_v42, 1 }
 0x43f   :  { %v913_v33 = vadd.f32 %v912_v44, %v911_v42  ;;  %v1100_v42 = vld [vmem:[%s2010_s2 + $0xc8] sm:$0xff] }
 0x441   :  { %v914_v34 = vmul.f32 %v913_v33, %v1866_v28  ;;  %v1101_v33 = vld [vmem:[%s2010_s2 + $0xd0] sm:$0xff] }
 0x443   :  { %v915_v50 = vadd.f32 1e-12, %v914_v34 }
 0x445   :  { %1448 = vrsqrt.f32 %v915_v50  ;;  %vm922_vm3 = vweird.f32 %v915_v50 }
 0x44b   :  { %v1449_v18 = vpop.eup %1448 }
 0x44c   :  { %v917_v31 = vmul.f32 %v1449_v18, %v915_v50  ;;  %vm923_vm2 = vweird.f32 %v1449_v18 }
 0x44d   :  { %vm924_vm4 = vmor %vm922_vm3, %vm923_vm2 }
 0x44e   :  { %v918_v43 = vmul.f32 %v1449_v18, %v917_v31  ;;  %v1102_v31 = vld [vmem:[%s2010_s2 + $0xd8] sm:$0xff] }
 0x450   :  { %v919_v51 = vmul.f32 0.5, %v918_v43 }
 0x452   :  { %v920_v54 = vsub.f32 1.5, %v919_v51  ;;  %v1465_v51 = vmov 3  }
 0x453   :  { %1411 = vset.pattern.permute.xlu1 %v1465_v51  ;;  %1412 = vset.pattern.permute.xlu0 %v1465_v51 }
 0x454   :  { %v921_v36 = vmul.f32 %v1449_v18, %v920_v54  ;;  %1413 = vset.pattern.permute.xlu2 %v1465_v51 }
 0x456   :  { %v925_v56 = vsel %vm924_vm4, %v1449_v18, %v921_v36  ;;  %v1452_v36 = vld [vmem:[%s2010_s2 + $0x100] sm:$0xff] }
 0x457   :  { %v929_v13 = vmul.f32 %v925_v56, %v896_v49  ;;  %v928_v61 = vmul.f32 %v925_v56, %v895_v21  ;;  %v927_v53 = vmul.f32 %v925_v56, %v894_v22  ;;  %v926_v58 = vmul.f32 %v925_v56, %v893_v11  ;;  %v1004_v11 = vpop.permute.xlu2 %1003  ;;  %v1009_v22 = vpop.permute.xlu1 %1008  ;;  %1265 = vperm.xlu1 %1411, %v1452_v36  }
 0x458   :  { %v999_v49 = vpop.permute.xlu0 %998 }
 0x459   :  { %v949_v0 = vmul.f32 %v944_v45, %v929_v13  ;;  %v948_v57 = vmul.f32 %v940_v52, %v928_v61  ;;  %v947_v1 = vmul.f32 %v936_v60, %v927_v53  ;;  %v946_v2 = vmul.f32 %v932_v47, %v926_v58  ;;  %v1103_v47 = vld [vmem:[%s2010_s2 + $0xe0] sm:$0xff]  ;;  %v1454_v13 = vld [vmem:[%s2010_s2 + $0x110] sm:$0xff]  ;;  %v1455_v61 = vld [vmem:[%s2010_s2 + $0x118] sm:$0xff] }
 0x45a   :  { %1273 = vperm.xlu2 %1413, %v1454_v13   ;;  %v1456_v53 = vld [vmem:[%s2010_s2 + $0x130] sm:$0xff]  ;;  %v1104_v60 = vld [vmem:[%s2010_s2 + $0xe8] sm:$0xff] }
 0x45b   :  { %v1874_v19 = vadd.f32 %v968_v4, %v949_v0  ;;  %v1876_v3 = vadd.f32 %v963_v59, %v948_v57  ;;  %v1879_v26 = vadd.f32 %v958_v8, %v947_v1  ;;  %v1882_v6 = vadd.f32 %v953_v10, %v946_v2  ;;  %v1453_v59 = vld [vmem:[%s2010_s2 + $0x108] sm:$0xff]  ;;  %v1457_v0 = vld [vmem:[%s2010_s2 + $0x120] sm:$0xff]  ;;  %v1105_v58 = vld [vmem:[%s2010_s2 + $0xf0] sm:$0xff] }
 0x45c   :  { %1269 = vperm.xlu0 %1412, %v1453_v59   ;;  %v1458_v57 = vld [vmem:[%s2010_s2 + $0x128] sm:$0xff]  ;;  %v1459_v1 = vld [vmem:[%s2010_s2 + $0x138] sm:$0xff] }
 0x45d   :  { %1062 = vmatpush.msrb.mxu2 %v1874_v19  ;;  %v1106_v2 = vld [vmem:[%s2010_s2 + $0xf8] sm:$0xff] }
 0x45f   :  { %1063 = vmatpush.msrb.mxu2 %v1876_v3  ;;  %v994_v25 = vpop.permute.xlu2 %993  ;;  %v989_v9 = vpop.permute.xlu1 %988  ;;  %1277 = vperm.xlu1 %1411, %v1455_v61  }
 0x461   :  { %1064 = vmatpush.msrb.mxu2 %v1879_v26 }
 0x462   :  { %1285 = vperm.xlu2 %1413, %v1457_v0  }
 0x463   :  { %1065 = vmatpush.msrb.mxu2 %v1882_v6 }
 0x464   :  { %1352 = vmatmul.msk.f32.vlgmr.msrb.gmra.mxu2 %vm145_vm6, %v974_v63  ;;  %1293 = vperm.xlu0 %1412, %v1456_v53  }
 0x467   :  { %1289 = vperm.xlu1 %1411, %v1458_v57  }
 0x46a   :  { %1297 = vperm.xlu2 %1413, %v1459_v1  }
 0x46c   :  { %1353 = vmatmul.msk.f32.gmra.mxu2 %vm145_vm6, %v975_v30 }
 0x474   :  { %1354 = vmatmul.msk.f32.gmra.mxu2 %vm145_vm6, %v976_v37 }
 0x47c   :  { %1355 = vmatmul.msk.f32.gmra.mxu2 %vm145_vm6, %v977_v12 }
 0x484   :  { %1356 = vmatmul.msk.f32.gmra.mxu2 %vm145_vm6, %v978_v27  ;;  %v1195_v27 = vpop.permute.xlu2 %1194 }
 0x48c   :  { %1357 = vmatmul.msk.f32.gmra.mxu2 %vm145_vm6, %v979_v15 }
 0x494   :  { %1358 = vmatmul.msk.f32.gmra.mxu2 %vm145_vm6, %v980_v16  ;;  %v1191_v16 = vpop.permute.xlu0 %1190 }
 0x49c   :  { %1359 = vmatmul.msk.f32.gmra.mxu2 %vm145_vm6, %v981_v17 }
 0x4e7   :  { %v1067_v20 = vpop.f32.mrf.mxu2 }
 0x4e8   :  { %v1068_v14 = vadd.f32 %v1067_v20, %v989_v9  ;;  %v1199_v20 = vpop.permute.xlu1 %1198 }
 0x4ea   :  { %v1091_v39 = vmax.f32 %v1068_v14, 0.0 }
 0x4ef   :  { %v1070_v5 = vpop.f32.mrf.mxu2 }
 0x4f0   :  { %v1071_v32 = vadd.f32 %v1070_v5, %v994_v25  ;;  %v1266_v1 = vpop.permute.xlu1 %1265 }
 0x4f2   :  { %v1092_v48 = vmax.f32 %v1071_v32, 0.0 }
 0x4f7   :  { %v1073_v21 = vpop.f32.mrf.mxu2 }
 0x4f8   :  { %v1074_v7 = vadd.f32 %v1073_v21, %v999_v49 }
 0x4fa   :  { %v1093_v41 = vmax.f32 %v1074_v7, 0.0 }
 0x4ff   :  { %v1076_v29 = vpop.f32.mrf.mxu2 }
 0x500   :  { %v1077_v24 = vadd.f32 %v1076_v29, %v1004_v11 }
 0x502   :  { %v1094_v35 = vmax.f32 %v1077_v24, 0.0  ;;  %v1203_v24 = vpop.permute.xlu2 %1202 }
 0x504   :  { %1172 = vmatpush.msrb.mxu1 %v1094_v35 }
 0x506   :  { %1173 = vmatpush.msrb.mxu1 %v1093_v41 }
 0x507   :  { %v1079_v62 = vpop.f32.mrf.mxu2 }
 0x508   :  { %1174 = vmatpush.msrb.mxu1 %v1092_v48  ;;  %v1080_v4 = vadd.f32 %v1079_v62, %v1009_v22 }
 0x50a   :  { %1175 = vmatpush.msrb.mxu1 %v1091_v39  ;;  %v1095_v56 = vmax.f32 %v1080_v4, 0.0 }
 0x50b   :  { %1364 = vmatmul.msk.f32.vlgmr.msrb.gmra.mxu1 %vm145_vm6, %v1099_v40 }
 0x50f   :  { %v1082_v55 = vpop.f32.mrf.mxu2 }
 0x510   :  { %v1083_v52 = vadd.f32 %v1082_v55, %v1014_v23 }
 0x512   :  { %v1096_v54 = vmax.f32 %v1083_v52, 0.0 }
 0x513   :  { %1365 = vmatmul.msk.f32.gmra.mxu1 %vm145_vm6, %v1100_v42 }
 0x517   :  { %v1085_v44 = vpop.f32.mrf.mxu2 }
 0x518   :  { %v1086_v45 = vadd.f32 %v1085_v44, %v1019_v38 }
 0x51a   :  { %v1097_v43 = vmax.f32 %v1086_v45, 0.0 }
 0x51b   :  { %1366 = vmatmul.msk.f32.gmra.mxu1 %vm145_vm6, %v1101_v33 }
 0x51f   :  { %v1088_v34 = vpop.f32.mrf.mxu2 }
 0x520   :  { %v1089_v50 = vadd.f32 %v1088_v34, %v1024_v46 }
 0x522   :  { %v1098_v18 = vmax.f32 %v1089_v50, 0.0 }
 0x523   :  { %1367 = vmatmul.msk.f32.gmra.mxu1 %vm145_vm6, %v1102_v31 }
 0x524   :  { %1131 = vmatpush.msra.mxu3 %v1098_v18 }
 0x526   :  { %1132 = vmatpush.msra.mxu3 %v1097_v43 }
 0x528   :  { %1133 = vmatpush.msra.mxu3 %v1096_v54 }
 0x52a   :  { %1134 = vmatpush.msra.mxu3 %v1095_v56 }
 0x52b   :  { %1360 = vmatmul.msk.f32.vlgmr.msra.gmra.mxu3 %vm145_vm6, %v1103_v47 }
 0x533   :  { %1361 = vmatmul.msk.f32.gmra.mxu3 %vm145_vm6, %v1104_v60 }
 0x53b   :  { %1362 = vmatmul.msk.f32.gmra.mxu3 %vm145_vm6, %v1105_v58 }
 0x543   :  { %1363 = vmatmul.msk.f32.gmra.mxu3 %vm145_vm6, %v1106_v2  ;;  %v1274_v2 = vpop.permute.xlu2 %1273 }
 0x588   :  { %v1177_v8 = vpop.f32.mrf.mxu1 }
 0x590   :  { %v1180_v63 = vpop.f32.mrf.mxu1 }
 0x598   :  { %v1183_v37 = vpop.f32.mrf.mxu1 }
 0x5a0   :  { %v1186_v22 = vpop.f32.mrf.mxu1 }
 0x5ae   :  { %v1136_v10 = vpop.f32.mrf.mxu3 }
 0x5af   :  { %v1178_v15 = vadd.f32 %v1177_v8, %v1136_v10 }
 0x5b1   :  { %v1205_v5 = vadd.f32 %v1191_v16, %v1178_v15  ;;  %v1270_v16 = vpop.permute.xlu0 %1269 }
 0x5b3   :  { %v1209_v21 = vadd.f32 %v1205_v5, %v1882_v6 }
 0x5b5   :  { %v1213_v9 = vsel %vm22_vm0, %v1209_v21, 0.0 }
 0x5b6   :  { %v1139_v30 = vpop.f32.mrf.mxu3 }
 0x5b7   :  { %v1181_v12 = vadd.f32 %v1180_v63, %v1139_v30 }
 0x5b9   :  { %v1206_v38 = vadd.f32 %v1195_v27, %v1181_v12  ;;  %v1286_v27 = vpop.permute.xlu2 %1285 }
 0x5bb   :  { %v1210_v11 = vadd.f32 %v1206_v38, %v1879_v26 }
 0x5bd   :  { %v1214_v29 = vsel %vm22_vm0, %v1210_v11, 0.0 }
 0x5be   :  { %v1142_v17 = vpop.f32.mrf.mxu3  ;;  %v1215_v14 = vadd.f32 %v1214_v29, %v1213_v9 }
 0x5bf   :  { %v1184_v23 = vadd.f32 %v1183_v37, %v1142_v17  ;;  %v1278_v37 = vpop.permute.xlu1 %1277 }
 0x5c1   :  { %v1207_v46 = vadd.f32 %v1199_v20, %v1184_v23  ;;  %v1298_v29 = vpop.permute.xlu2 %1297 }
 0x5c3   :  { %v1211_v49 = vadd.f32 %v1207_v46, %v1876_v3 }
 0x5c5   :  { %v1216_v32 = vsel %vm22_vm0, %v1211_v49, 0.0 }
 0x5c6   :  { %v1145_v25 = vpop.f32.mrf.mxu3  ;;  %v1217_v48 = vadd.f32 %v1216_v32, %v1215_v14 }
 0x5c7   :  { %v1187_v7 = vadd.f32 %v1186_v22, %v1145_v25  ;;  %v1290_v22 = vpop.permute.xlu1 %1289 }
 0x5c9   :  { %v1208_v35 = vadd.f32 %v1203_v24, %v1187_v7  ;;  %v1294_v24 = vpop.permute.xlu0 %1293 }
 0x5cb   :  { %v1212_v41 = vadd.f32 %v1208_v35, %v1874_v19 }
 0x5cd   :  { %v1218_v26 = vsel %vm22_vm0, %v1212_v41, 0.0 }
 0x5ce   :  { %v1219_v62 = vadd.f32 %v1218_v26, %v1217_v48 }
 0x5d0   :  { %v1220_v6 = vrot.slane %v1219_v62, 4 }
 0x5d2   :  { %v1221_v39 = vadd.f32 %v1220_v6, %v1219_v62 }
 0x5d4   :  { %v1222_v3 = vrot.slane %v1221_v39, 2 }
 0x5d6   :  { %v1223_v40 = vadd.f32 %v1222_v3, %v1221_v39 }
 0x5d8   :  { %v1224_v55 = vrot.slane %v1223_v40, 1 }
 0x5da   :  { %v1225_v42 = vadd.f32 %v1224_v55, %v1223_v40 }
 0x5dc   :  { %v1226_v44 = vmul.f32 %v1225_v42, %v1866_v28 }
 0x5de   :  { %v1228_v33 = vsub.f32 %v1210_v11, %v1226_v44  ;;  %v1229_v34 = vsub.f32 %v1211_v49, %v1226_v44  ;;  %v1230_v45 = vsub.f32 %v1212_v41, %v1226_v44  ;;  %v1227_v50 = vsub.f32 %v1209_v21, %v1226_v44 }
 0x5e0   :  { %v1231_v52 = vmul.f32 %v1227_v50, %v1227_v50  ;;  %v1232_v18 = vmul.f32 %v1228_v33, %v1228_v33  ;;  %v1233_v31 = vmul.f32 %v1229_v34, %v1229_v34  ;;  %v1234_v19 = vmul.f32 %v1230_v45, %v1230_v45 }
 0x5e2   :  { %v1235_v4 = vsel %vm22_vm0, %v1231_v52, 0.0  ;;  %v1236_v43 = vsel %vm22_vm0, %v1232_v18, 0.0  ;;  %v1238_v54 = vsel %vm22_vm0, %v1233_v31, 0.0  ;;  %v1240_v59 = vsel %vm22_vm0, %v1234_v19, 0.0 }
 0x5e3   :  { %v1237_v51 = vadd.f32 %v1236_v43, %v1235_v4 }
 0x5e5   :  { %v1239_v36 = vadd.f32 %v1238_v54, %v1237_v51 }
 0x5e7   :  { %v1241_v56 = vadd.f32 %v1240_v59, %v1239_v36 }
 0x5e9   :  { %v1242_v47 = vrot.slane %v1241_v56, 4 }
 0x5eb   :  { %v1243_v13 = vadd.f32 %v1242_v47, %v1241_v56 }
 0x5ed   :  { %v1244_v61 = vrot.slane %v1243_v13, 2 }
 0x5ef   :  { %v1245_v53 = vadd.f32 %v1244_v61, %v1243_v13 }
 0x5f1   :  { %v1246_v60 = vrot.slane %v1245_v53, 1 }
 0x5f3   :  { %v1247_v0 = vadd.f32 %v1246_v60, %v1245_v53 }
 0x5f5   :  { %v1248_v57 = vmul.f32 %v1247_v0, %v1866_v28 }
 0x5f7   :  { %v1249_v58 = vadd.f32 1e-12, %v1248_v57 }
 0x5f9   :  { %1450 = vrsqrt.f32 %v1249_v58  ;;  %vm1256_vm5 = vweird.f32 %v1249_v58 }
 0x5ff   :  { %v1451_v8 = vpop.eup %1450 }
 0x600   :  { %v1251_v10 = vmul.f32 %v1451_v8, %v1249_v58  ;;  %vm1257_vm6 = vweird.f32 %v1451_v8 }
 0x601   :  { %vm1258_vm7 = vmor %vm1256_vm5, %vm1257_vm6 }
 0x602   :  { %v1252_v63 = vmul.f32 %v1451_v8, %v1251_v10 }
 0x604   :  { %v1253_v30 = vmul.f32 0.5, %v1252_v63 }
 0x606   :  { %v1254_v12 = vsub.f32 1.5, %v1253_v30 }
 0x608   :  { %v1255_v15 = vmul.f32 %v1451_v8, %v1254_v12 }
 0x60a   :  { %v1259_v17 = vsel %vm1258_vm7, %v1451_v8, %v1255_v15 }
 0x60b   :  { %v1260_v20 = vmul.f32 %v1259_v17, %v1227_v50  ;;  %v1262_v38 = vmul.f32 %v1259_v17, %v1229_v34  ;;  %v1263_v28 = vmul.f32 %v1259_v17, %v1230_v45  ;;  %v1261_v23 = vmul.f32 %v1259_v17, %v1228_v33 }
 0x60d   :  { %v1280_v5 = vmul.f32 %v1266_v1, %v1260_v20  ;;  %v1283_v46 = vmul.f32 %v1278_v37, %v1263_v28  ;;  %v1281_v11 = vmul.f32 %v1270_v16, %v1261_v23  ;;  %v1282_v21 = vmul.f32 %v1274_v2, %v1262_v38 }
 0x60f   :  { %v1300_v49 = vadd.f32 %v1286_v27, %v1280_v5  ;;  %v1301_v25 = vadd.f32 %v1290_v22, %v1281_v11  ;;  %v1303_v7 = vadd.f32 %v1298_v29, %v1283_v46  ;;  %v1302_v9 = vadd.f32 %v1294_v24, %v1282_v21 }
 0x611   :  { %1304 = vst.msk [vmem:[#allocation2] sm:$0xff] %vm22_vm0, %v1300_v49 }
 0x612   :  { %1308 = vst.msk [vmem:[%s2011_s3] sm:$0xff] %vm22_vm0, %v1300_v49 }
 0x613   :  { %1305 = vst.msk [vmem:[#allocation2 + $0x8] sm:$0xff] %vm22_vm0, %v1301_v25 }
 0x614   :  { %1309 = vst.msk [vmem:[%s2011_s3 + $0x8] sm:$0xff] %vm22_vm0, %v1301_v25 }
 0x615   :  { %1307 = vst.msk [vmem:[#allocation2 + $0x18] sm:$0xff] %vm22_vm0, %v1303_v7 }
 0x616   :  { %1311 = vst.msk [vmem:[%s2011_s3 + $0x18] sm:$0xff] %vm22_vm0, %v1303_v7 }
 0x617   :  { %1306 = vst.msk [vmem:[#allocation2 + $0x10] sm:$0xff] %vm22_vm0, %v1302_v9 }
 0x618   :  { %1310 = vst.msk [vmem:[%s2011_s3 + $0x10] sm:$0xff] %vm22_vm0, %v1302_v9 }

</bundles_post_ra>
